<compile_context>
chip_gen: v5e
topology: v5e:2x2
jax: 0.10.0
libtpu: 0.0.40
codegen_flags: <defaults>
</compile_context>

<pallas_src>
import functools

import jax
import jax.numpy as jnp
import numpy as np
from jax import lax
from jax.experimental import pallas as pl
from jax.experimental.pallas import tpu as pltpu


def _round_up(x, m):
    return (x + m - 1) // m * m


def _srnn_kernel(uproj_ref,   # (Tc, Bb, NXP)  u @ K^T + H_b, time chunk
                 h0_ref,      # (Bb, NXP)      initial hidden state (padded)
                 hwT_ref,     # (NXP, NXP)     H.weight^T (padded)
                 einv_ref,    # (NXP, NXP)     E^{-1} (padded)
                 cwT_ref,     # (NXP, NYP)     output_layer.weight^T (padded)
                 cb_ref,      # (1, NYP)       output_layer.bias (padded)
                 yest_ref,    # (Tc, Bb, NYP)  output chunk
                 states_ref,  # (Tc, Bb, NXP)  states chunk
                 h_scratch):  # (Bb, NXP)      carries h across time chunks
    # Grid = (batch_blocks, time_chunks); time axis is innermost & sequential.
    # At the first time chunk of each batch block, (re)load the initial state.
    @pl.when(pl.program_id(1) == 0)
    def _():
        h_scratch[...] = h0_ref[...]

    t_chunk = uproj_ref.shape[0]
    bsz = h0_ref.shape[0]
    nyp = cb_ref.shape[1]

    # Resident operands: read once per chunk, stay in vregs (off the chain).
    hwT = hwT_ref[...]
    einv = einv_ref[...]
    cwT = cwT_ref[...]
    cb = jnp.broadcast_to(cb_ref[...], (bsz, nyp))   # hoisted broadcast

    def step(i, h):
        # Outputs for global step t depend only on h_t (not on the update),
        # so they fill otherwise idle MXU/VPU slots off the critical chain.
        states_ref[i] = h
        yest_ref[i] = jnp.dot(h, cwT, preferred_element_type=jnp.float32) + cb
        # Recurrence: h_{t+1} = ReLU(h_t @ H^T + (u_t @ K^T + b_H)) @ E^{-1}
        pre = jnp.dot(h, hwT, preferred_element_type=jnp.float32) + uproj_ref[i]
        eh = jnp.maximum(pre, 0.0)
        return jnp.dot(eh, einv, preferred_element_type=jnp.float32)

    # h carried in registers; fully unrolled for LLO cross-iteration scheduling.
    h_final = lax.fori_loop(0, t_chunk, step, h_scratch[...], unroll=True)
    h_scratch[...] = h_final


@functools.partial(jax.jit, static_argnames=("t_chunk",))
def srnn_forward(inputs, h0, H_w, H_b, K_w, E, C_w, C_b, *, t_chunk=None):
    """inputs: (B, T, nu) batch-major (PyTorch convention). Returns (yest, states)."""
    B, T, nu = inputs.shape
    nx = H_w.shape[0]
    ny = C_w.shape[0]

    # ---- parameter / layout glue (plain XLA, not the hot path) -------------
    E_inv = jnp.linalg.inv(E)

    # Hoisted, non-recurrent input projection: one big MXU-friendly matmul.
    # u_proj[:, t, :] = u[:, t, :] @ K_w.T + H_b   (H bias folded in here)
    uproj = inputs.astype(jnp.float32) @ K_w.T + H_b          # (B, T, nx)
    uproj = jnp.transpose(uproj, (1, 0, 2))                   # (T, B, nx)

    # Lane/sublane-dense padding: batch -> x8 sublanes, nx/ny -> x128 lanes.
    Bp = _round_up(B, 8)
    NXP = _round_up(nx, 128)
    NYP = _round_up(ny, 128)

    if t_chunk is None:
        t_chunk = min(T, 32)
    t_chunk = min(t_chunk, T)
    Tp = _round_up(T, t_chunk)
    n_t = Tp // t_chunk

    # Batch block = whole padded batch (one block here); the leading grid axis
    # is kept so large batches can be split across v7x's two TensorCores.
    b_chunk = Bp
    n_b = Bp // b_chunk

    f32 = jnp.float32
    uproj_p = jnp.zeros((Tp, Bp, NXP), f32).at[:T, :B, :nx].set(uproj)
    h0_p = jnp.zeros((Bp, NXP), f32).at[:B, :nx].set(h0.astype(f32))
    hwT_p = jnp.zeros((NXP, NXP), f32).at[:nx, :nx].set(H_w.T.astype(f32))
    einv_p = jnp.zeros((NXP, NXP), f32).at[:nx, :nx].set(E_inv.astype(f32))
    cwT_p = jnp.zeros((NXP, NYP), f32).at[:nx, :ny].set(C_w.T.astype(f32))
    cb_p = jnp.zeros((1, NYP), f32).at[0, :ny].set(C_b.astype(f32))

    yest_p, states_p = pl.pallas_call(
        _srnn_kernel,
        out_shape=(
            jax.ShapeDtypeStruct((Tp, Bp, NYP), f32),
            jax.ShapeDtypeStruct((Tp, Bp, NXP), f32),
        ),
        grid=(n_b, n_t),
        in_specs=[
            pl.BlockSpec((t_chunk, b_chunk, NXP), lambda b, g: (g, b, 0)),
            pl.BlockSpec((b_chunk, NXP), lambda b, g: (b, 0)),
            pl.BlockSpec((NXP, NXP), lambda b, g: (0, 0)),
            pl.BlockSpec((NXP, NXP), lambda b, g: (0, 0)),
            pl.BlockSpec((NXP, NYP), lambda b, g: (0, 0)),
            pl.BlockSpec((1, NYP), lambda b, g: (0, 0)),
        ],
        out_specs=(
            pl.BlockSpec((t_chunk, b_chunk, NYP), lambda b, g: (g, b, 0)),
            pl.BlockSpec((t_chunk, b_chunk, NXP), lambda b, g: (g, b, 0)),
        ),
        scratch_shapes=[pltpu.VMEM((b_chunk, NXP), f32)],
        compiler_params=pltpu.CompilerParams(
            dimension_semantics=("parallel", "arbitrary")),
    )(uproj_p, h0_p, hwT_p, einv_p, cwT_p, cb_p)

    # Slice away padding, back to batch-major (B, T, ...).
    yest = jnp.transpose(yest_p[:T, :B, :ny], (1, 0, 2))
    states = jnp.transpose(states_p[:T, :B, :nx], (1, 0, 2))
    return yest, states


def srnn_forward_ref(inputs, h0, H_w, H_b, K_w, E, C_w, C_b):
    """Pure-JAX reference mirroring the PyTorch forward."""
    B, T, _ = inputs.shape
    E_inv = jnp.linalg.inv(E)
    ht = h0
    outs = [ht]
    for tt in range(T - 1):
        xt = ht @ H_w.T + H_b + inputs[:, tt, :] @ K_w.T
        eh = jnp.maximum(xt, 0.0)
        ht = eh @ E_inv
        outs.append(ht)
    states = jnp.stack(outs, axis=1)
    yest = states @ C_w.T + C_b
    return yest, states


if __name__ == "__main__":
    # Small shapes consistent with the module's forward.
    B, T = 2, 8            # batch, sequence length
    nu, nx, ny = 4, 32, 3  # input_size, hidden_size, output_size

    key = jax.random.PRNGKey(0)
    k_in, k_h0, k_hb, k_kw, k_cw, k_cb, k_e = jax.random.split(key, 7)

    inputs = jax.random.normal(k_in, (B, T, nu), dtype=jnp.float32)

    # Deterministic parameter init following sRNN.__init__ shapes:
    h0 = jax.random.uniform(k_h0, (B, nx), dtype=jnp.float32)          # torch.rand(batches, nx)
    H_w = jnp.eye(nx, dtype=jnp.float32)                               # H.weight.data = eye
    H_b = (jax.random.uniform(k_hb, (nx,), dtype=jnp.float32) - 0.5) * 0.2
    K_w = (jax.random.uniform(k_kw, (nx, nu), dtype=jnp.float32) - 0.5) * 0.5  # Linear(nu, nx, bias=False)
    # E0 = eye in __init__; small perturbation so the inverse path is non-trivial.
    E = jnp.eye(nx, dtype=jnp.float32) + 0.05 * jax.random.normal(k_e, (nx, nx), dtype=jnp.float32)
    C_w = (jax.random.uniform(k_cw, (ny, nx), dtype=jnp.float32) - 0.5) * 0.3  # output_layer.weight
    C_b = (jax.random.uniform(k_cb, (ny,), dtype=jnp.float32) - 0.5) * 0.1     # output_layer.bias

    # t_chunk=4 -> two time chunks, exercising the cross-chunk state carry.
    yest, states = srnn_forward(inputs, h0, H_w, H_b, K_w, E, C_w, C_b, t_chunk=4)
    yest, states = jax.block_until_ready(yest), jax.block_until_ready(states)

    yest_ref, states_ref = srnn_forward_ref(inputs, h0, H_w, H_b, K_w, E, C_w, C_b)
    np.testing.assert_allclose(np.asarray(states), np.asarray(states_ref), rtol=1e-4, atol=1e-5)
    np.testing.assert_allclose(np.asarray(yest), np.asarray(yest_ref), rtol=1e-4, atol=1e-5)

    assert yest.shape == (B, T, ny) and states.shape == (B, T, nx)
    print("KERNEL_OK")
</pallas_src>

<mosaic_0001>
module attributes {stable_mosaic.version = 11 : i64} {
  func.func @_srnn_kernel(%arg0: i32, %arg1: i32, %arg2: memref<4x8x128xf32, #tpu.memory_space<vmem>>, %arg3: memref<8x128xf32, #tpu.memory_space<vmem>>, %arg4: memref<128x128xf32, #tpu.memory_space<vmem>>, %arg5: memref<128x128xf32, #tpu.memory_space<vmem>>, %arg6: memref<128x128xf32, #tpu.memory_space<vmem>>, %arg7: memref<1x128xf32, #tpu.memory_space<vmem>>, %arg8: memref<4x8x128xf32, #tpu.memory_space<vmem>>, %arg9: memref<4x8x128xf32, #tpu.memory_space<vmem>>, %arg10: memref<8x128xf32, #tpu.memory_space<vmem>>) attributes {dimension_semantics = [#tpu.dimension_semantics<parallel>, #tpu.dimension_semantics<arbitrary>], iteration_bounds = array<i64: 1, 2>, scalar_prefetch = 0 : i64, scratch_operands = 1 : i64, tpu.core_type = #tpu.core_type<tc>, window_params = [{transform_indices = @transform_0, window_bounds = array<i64: 4, 8, 128>}, {transform_indices = @transform_1, window_bounds = array<i64: 8, 128>}, {pipeline_mode = #tpu.pipeline_mode<synchronous>, transform_indices = @transform_2, window_bounds = array<i64: 128, 128>}, {pipeline_mode = #tpu.pipeline_mode<synchronous>, transform_indices = @transform_3, window_bounds = array<i64: 128, 128>}, {pipeline_mode = #tpu.pipeline_mode<synchronous>, transform_indices = @transform_4, window_bounds = array<i64: 128, 128>}, {pipeline_mode = #tpu.pipeline_mode<synchronous>, transform_indices = @transform_5, window_bounds = array<i64: 1, 128>}, {transform_indices = @transform_6, window_bounds = array<i64: 4, 8, 128>}, {transform_indices = @transform_7, window_bounds = array<i64: 4, 8, 128>}]} {
    %c0_i32 = arith.constant 0 : i32
    %0 = arith.cmpi eq, %arg1, %c0_i32 : i32
    %1 = arith.extui %0 : i1 to i32
    %c0_i32_0 = arith.constant 0 : i32
    %2 = arith.cmpi ne, %1, %c0_i32_0 : i32
    scf.if %2 {
      %c0_52 = arith.constant 0 : index
      %c0_53 = arith.constant 0 : index
      %83 = vector.load %arg3[%c0_52, %c0_53] : memref<8x128xf32, #tpu.memory_space<vmem>>, vector<8x128xf32>
      %c0_54 = arith.constant 0 : index
      %c0_55 = arith.constant 0 : index
      %84 = vector.load %arg10[%c0_54, %c0_55] : memref<8x128xf32, #tpu.memory_space<vmem>>, vector<8x128xf32>
      tpu.vector_store %arg10[%c0_54, %c0_55], %83 {strides = array<i32>} : memref<8x128xf32, #tpu.memory_space<vmem>>, vector<8x128xf32>,
    } else {
    }
    %c0 = arith.constant 0 : index
    %c0_1 = arith.constant 0 : index
    %3 = vector.load %arg4[%c0, %c0_1] : memref<128x128xf32, #tpu.memory_space<vmem>>, vector<128x128xf32>
    %c0_2 = arith.constant 0 : index
    %c0_3 = arith.constant 0 : index
    %4 = vector.load %arg5[%c0_2, %c0_3] : memref<128x128xf32, #tpu.memory_space<vmem>>, vector<128x128xf32>
    %c0_4 = arith.constant 0 : index
    %c0_5 = arith.constant 0 : index
    %5 = vector.load %arg6[%c0_4, %c0_5] : memref<128x128xf32, #tpu.memory_space<vmem>>, vector<128x128xf32>
    %c0_6 = arith.constant 0 : index
    %c0_7 = arith.constant 0 : index
    %6 = vector.load %arg7[%c0_6, %c0_7] : memref<1x128xf32, #tpu.memory_space<vmem>>, vector<1x128xf32>
    %7 = vector.shape_cast %6 : vector<1x128xf32> to vector<1x128xf32>
    %8 = vector.broadcast %7 : vector<1x128xf32> to vector<8x128xf32>
    %c0_8 = arith.constant 0 : index
    %c0_9 = arith.constant 0 : index
    %9 = vector.load %arg10[%c0_8, %c0_9] : memref<8x128xf32, #tpu.memory_space<vmem>>, vector<8x128xf32>
    %c0_i32_10 = arith.constant 0 : i32
    %10 = arith.index_cast %c0_i32_10 : i32 to index
    %c0_11 = arith.constant 0 : index
    %c0_12 = arith.constant 0 : index
    %11 = vector.load %arg9[%10, %c0_11, %c0_12] : memref<4x8x128xf32, #tpu.memory_space<vmem>>, vector<1x8x128xf32>
    %12 = vector.shape_cast %11 : vector<1x8x128xf32> to vector<8x128xf32>
    %13 = vector.shape_cast %9 : vector<8x128xf32> to vector<1x8x128xf32>
    tpu.vector_store %arg9[%10, %c0_11, %c0_12], %13 {strides = array<i32>} : memref<4x8x128xf32, #tpu.memory_space<vmem>>, vector<1x8x128xf32>,
    %cst = arith.constant dense<0.000000e+00> : vector<8x128xf32>
    %14 = tpu.matmul %9, %5, %cst {dimension_numbers = #tpu.dot_dimension_numbers<[1], [0], [0], [1], [0, 0, 1, 1], [], []>} : vector<8x128xf32>, vector<128x128xf32>, vector<8x128xf32> -> vector<8x128xf32>
    %15 = arith.addf %14, %8 : vector<8x128xf32>
    %16 = arith.index_cast %c0_i32_10 : i32 to index
    %c0_13 = arith.constant 0 : index
    %c0_14 = arith.constant 0 : index
    %17 = vector.load %arg8[%16, %c0_13, %c0_14] : memref<4x8x128xf32, #tpu.memory_space<vmem>>, vector<1x8x128xf32>
    %18 = vector.shape_cast %17 : vector<1x8x128xf32> to vector<8x128xf32>
    %19 = vector.shape_cast %15 : vector<8x128xf32> to vector<1x8x128xf32>
    tpu.vector_store %arg8[%16, %c0_13, %c0_14], %19 {strides = array<i32>} : memref<4x8x128xf32, #tpu.memory_space<vmem>>, vector<1x8x128xf32>,
    %cst_15 = arith.constant dense<0.000000e+00> : vector<8x128xf32>
    %20 = tpu.matmul %9, %3, %cst_15 {dimension_numbers = #tpu.dot_dimension_numbers<[1], [0], [0], [1], [0, 0, 1, 1], [], []>} : vector<8x128xf32>, vector<128x128xf32>, vector<8x128xf32> -> vector<8x128xf32>
    %21 = arith.index_cast %c0_i32_10 : i32 to index
    %c0_16 = arith.constant 0 : index
    %c0_17 = arith.constant 0 : index
    %22 = vector.load %arg2[%21, %c0_16, %c0_17] : memref<4x8x128xf32, #tpu.memory_space<vmem>>, vector<1x8x128xf32>
    %23 = vector.shape_cast %22 : vector<1x8x128xf32> to vector<8x128xf32>
    %24 = arith.addf %20, %23 : vector<8x128xf32>
    %cst_18 = arith.constant 0.000000e+00 : f32
    %25 = vector.broadcast %cst_18 : f32 to vector<8x128xf32>
    %26 = arith.maximumf %24, %25 : vector<8x128xf32>
    %cst_19 = arith.constant dense<0.000000e+00> : vector<8x128xf32>
    %27 = tpu.matmul %26, %4, %cst_19 {dimension_numbers = #tpu.dot_dimension_numbers<[1], [0], [0], [1], [0, 0, 1, 1], [], []>} : vector<8x128xf32>, vector<128x128xf32>, vector<8x128xf32> -> vector<8x128xf32>
    %c1_i32 = arith.constant 1 : i32
    %28 = arith.index_cast %c1_i32 : i32 to index
    %c0_20 = arith.constant 0 : index
    %c0_21 = arith.constant 0 : index
    %29 = vector.load %arg9[%28, %c0_20, %c0_21] : memref<4x8x128xf32, #tpu.memory_space<vmem>>, vector<1x8x128xf32>
    %30 = vector.shape_cast %29 : vector<1x8x128xf32> to vector<8x128xf32>
    %31 = vector.shape_cast %27 : vector<8x128xf32> to vector<1x8x128xf32>
    tpu.vector_store %arg9[%28, %c0_20, %c0_21], %31 {strides = array<i32>} : memref<4x8x128xf32, #tpu.memory_space<vmem>>, vector<1x8x128xf32>,
    %cst_22 = arith.constant dense<0.000000e+00> : vector<8x128xf32>
    %32 = tpu.matmul %27, %5, %cst_22 {dimension_numbers = #tpu.dot_dimension_numbers<[1], [0], [0], [1], [0, 0, 1, 1], [], []>} : vector<8x128xf32>, vector<128x128xf32>, vector<8x128xf32> -> vector<8x128xf32>
    %33 = arith.addf %32, %8 : vector<8x128xf32>
    %34 = arith.index_cast %c1_i32 : i32 to index
    %c0_23 = arith.constant 0 : index
    %c0_24 = arith.constant 0 : index
    %35 = vector.load %arg8[%34, %c0_23, %c0_24] : memref<4x8x128xf32, #tpu.memory_space<vmem>>, vector<1x8x128xf32>
    %36 = vector.shape_cast %35 : vector<1x8x128xf32> to vector<8x128xf32>
    %37 = vector.shape_cast %33 : vector<8x128xf32> to vector<1x8x128xf32>
    tpu.vector_store %arg8[%34, %c0_23, %c0_24], %37 {strides = array<i32>} : memref<4x8x128xf32, #tpu.memory_space<vmem>>, vector<1x8x128xf32>,
    %cst_25 = arith.constant dense<0.000000e+00> : vector<8x128xf32>
    %38 = tpu.matmul %27, %3, %cst_25 {dimension_numbers = #tpu.dot_dimension_numbers<[1], [0], [0], [1], [0, 0, 1, 1], [], []>} : vector<8x128xf32>, vector<128x128xf32>, vector<8x128xf32> -> vector<8x128xf32>
    %39 = arith.index_cast %c1_i32 : i32 to index
    %c0_26 = arith.constant 0 : index
    %c0_27 = arith.constant 0 : index
    %40 = vector.load %arg2[%39, %c0_26, %c0_27] : memref<4x8x128xf32, #tpu.memory_space<vmem>>, vector<1x8x128xf32>
    %41 = vector.shape_cast %40 : vector<1x8x128xf32> to vector<8x128xf32>
    %42 = arith.addf %38, %41 : vector<8x128xf32>
    %cst_28 = arith.constant 0.000000e+00 : f32
    %43 = vector.broadcast %cst_28 : f32 to vector<8x128xf32>
    %44 = arith.maximumf %42, %43 : vector<8x128xf32>
    %cst_29 = arith.constant dense<0.000000e+00> : vector<8x128xf32>
    %45 = tpu.matmul %44, %4, %cst_29 {dimension_numbers = #tpu.dot_dimension_numbers<[1], [0], [0], [1], [0, 0, 1, 1], [], []>} : vector<8x128xf32>, vector<128x128xf32>, vector<8x128xf32> -> vector<8x128xf32>
    %c2_i32 = arith.constant 2 : i32
    %46 = arith.index_cast %c2_i32 : i32 to index
    %c0_30 = arith.constant 0 : index
    %c0_31 = arith.constant 0 : index
    %47 = vector.load %arg9[%46, %c0_30, %c0_31] : memref<4x8x128xf32, #tpu.memory_space<vmem>>, vector<1x8x128xf32>
    %48 = vector.shape_cast %47 : vector<1x8x128xf32> to vector<8x128xf32>
    %49 = vector.shape_cast %45 : vector<8x128xf32> to vector<1x8x128xf32>
    tpu.vector_store %arg9[%46, %c0_30, %c0_31], %49 {strides = array<i32>} : memref<4x8x128xf32, #tpu.memory_space<vmem>>, vector<1x8x128xf32>,
    %cst_32 = arith.constant dense<0.000000e+00> : vector<8x128xf32>
    %50 = tpu.matmul %45, %5, %cst_32 {dimension_numbers = #tpu.dot_dimension_numbers<[1], [0], [0], [1], [0, 0, 1, 1], [], []>} : vector<8x128xf32>, vector<128x128xf32>, vector<8x128xf32> -> vector<8x128xf32>
    %51 = arith.addf %50, %8 : vector<8x128xf32>
    %52 = arith.index_cast %c2_i32 : i32 to index
    %c0_33 = arith.constant 0 : index
    %c0_34 = arith.constant 0 : index
    %53 = vector.load %arg8[%52, %c0_33, %c0_34] : memref<4x8x128xf32, #tpu.memory_space<vmem>>, vector<1x8x128xf32>
    %54 = vector.shape_cast %53 : vector<1x8x128xf32> to vector<8x128xf32>
    %55 = vector.shape_cast %51 : vector<8x128xf32> to vector<1x8x128xf32>
    tpu.vector_store %arg8[%52, %c0_33, %c0_34], %55 {strides = array<i32>} : memref<4x8x128xf32, #tpu.memory_space<vmem>>, vector<1x8x128xf32>,
    %cst_35 = arith.constant dense<0.000000e+00> : vector<8x128xf32>
    %56 = tpu.matmul %45, %3, %cst_35 {dimension_numbers = #tpu.dot_dimension_numbers<[1], [0], [0], [1], [0, 0, 1, 1], [], []>} : vector<8x128xf32>, vector<128x128xf32>, vector<8x128xf32> -> vector<8x128xf32>
    %57 = arith.index_cast %c2_i32 : i32 to index
    %c0_36 = arith.constant 0 : index
    %c0_37 = arith.constant 0 : index
    %58 = vector.load %arg2[%57, %c0_36, %c0_37] : memref<4x8x128xf32, #tpu.memory_space<vmem>>, vector<1x8x128xf32>
    %59 = vector.shape_cast %58 : vector<1x8x128xf32> to vector<8x128xf32>
    %60 = arith.addf %56, %59 : vector<8x128xf32>
    %cst_38 = arith.constant 0.000000e+00 : f32
    %61 = vector.broadcast %cst_38 : f32 to vector<8x128xf32>
    %62 = arith.maximumf %60, %61 : vector<8x128xf32>
    %cst_39 = arith.constant dense<0.000000e+00> : vector<8x128xf32>
    %63 = tpu.matmul %62, %4, %cst_39 {dimension_numbers = #tpu.dot_dimension_numbers<[1], [0], [0], [1], [0, 0, 1, 1], [], []>} : vector<8x128xf32>, vector<128x128xf32>, vector<8x128xf32> -> vector<8x128xf32>
    %c3_i32 = arith.constant 3 : i32
    %64 = arith.index_cast %c3_i32 : i32 to index
    %c0_40 = arith.constant 0 : index
    %c0_41 = arith.constant 0 : index
    %65 = vector.load %arg9[%64, %c0_40, %c0_41] : memref<4x8x128xf32, #tpu.memory_space<vmem>>, vector<1x8x128xf32>
    %66 = vector.shape_cast %65 : vector<1x8x128xf32> to vector<8x128xf32>
    %67 = vector.shape_cast %63 : vector<8x128xf32> to vector<1x8x128xf32>
    tpu.vector_store %arg9[%64, %c0_40, %c0_41], %67 {strides = array<i32>} : memref<4x8x128xf32, #tpu.memory_space<vmem>>, vector<1x8x128xf32>,
    %cst_42 = arith.constant dense<0.000000e+00> : vector<8x128xf32>
    %68 = tpu.matmul %63, %5, %cst_42 {dimension_numbers = #tpu.dot_dimension_numbers<[1], [0], [0], [1], [0, 0, 1, 1], [], []>} : vector<8x128xf32>, vector<128x128xf32>, vector<8x128xf32> -> vector<8x128xf32>
    %69 = arith.addf %68, %8 : vector<8x128xf32>
    %70 = arith.index_cast %c3_i32 : i32 to index
    %c0_43 = arith.constant 0 : index
    %c0_44 = arith.constant 0 : index
    %71 = vector.load %arg8[%70, %c0_43, %c0_44] : memref<4x8x128xf32, #tpu.memory_space<vmem>>, vector<1x8x128xf32>
    %72 = vector.shape_cast %71 : vector<1x8x128xf32> to vector<8x128xf32>
    %73 = vector.shape_cast %69 : vector<8x128xf32> to vector<1x8x128xf32>
    tpu.vector_store %arg8[%70, %c0_43, %c0_44], %73 {strides = array<i32>} : memref<4x8x128xf32, #tpu.memory_space<vmem>>, vector<1x8x128xf32>,
    %cst_45 = arith.constant dense<0.000000e+00> : vector<8x128xf32>
    %74 = tpu.matmul %63, %3, %cst_45 {dimension_numbers = #tpu.dot_dimension_numbers<[1], [0], [0], [1], [0, 0, 1, 1], [], []>} : vector<8x128xf32>, vector<128x128xf32>, vector<8x128xf32> -> vector<8x128xf32>
    %75 = arith.index_cast %c3_i32 : i32 to index
    %c0_46 = arith.constant 0 : index
    %c0_47 = arith.constant 0 : index
    %76 = vector.load %arg2[%75, %c0_46, %c0_47] : memref<4x8x128xf32, #tpu.memory_space<vmem>>, vector<1x8x128xf32>
    %77 = vector.shape_cast %76 : vector<1x8x128xf32> to vector<8x128xf32>
    %78 = arith.addf %74, %77 : vector<8x128xf32>
    %cst_48 = arith.constant 0.000000e+00 : f32
    %79 = vector.broadcast %cst_48 : f32 to vector<8x128xf32>
    %80 = arith.maximumf %78, %79 : vector<8x128xf32>
    %cst_49 = arith.constant dense<0.000000e+00> : vector<8x128xf32>
    %81 = tpu.matmul %80, %4, %cst_49 {dimension_numbers = #tpu.dot_dimension_numbers<[1], [0], [0], [1], [0, 0, 1, 1], [], []>} : vector<8x128xf32>, vector<128x128xf32>, vector<8x128xf32> -> vector<8x128xf32>
    %c4_i32 = arith.constant 4 : i32
    %c0_50 = arith.constant 0 : index
    %c0_51 = arith.constant 0 : index
    %82 = vector.load %arg10[%c0_50, %c0_51] : memref<8x128xf32, #tpu.memory_space<vmem>>, vector<8x128xf32>
    tpu.vector_store %arg10[%c0_50, %c0_51], %81 {strides = array<i32>} : memref<8x128xf32, #tpu.memory_space<vmem>>, vector<8x128xf32>,
    return
  }
  func.func @transform_0(%arg0: i32, %arg1: i32) -> (i32, i32, i32) {
    %c0_i32 = arith.constant 0 : i32
    %c0_i32_0 = arith.constant 0 : i32
    return %arg1, %arg0, %c0_i32 : i32, i32, i32
  }
  func.func @transform_1(%arg0: i32, %arg1: i32) -> (i32, i32) {
    %c0_i32 = arith.constant 0 : i32
    %c0_i32_0 = arith.constant 0 : i32
    return %arg0, %c0_i32 : i32, i32
  }
  func.func @transform_2(%arg0: i32, %arg1: i32) -> (i32, i32) {
    %c0_i32 = arith.constant 0 : i32
    %c0_i32_0 = arith.constant 0 : i32
    %c0_i32_1 = arith.constant 0 : i32
    return %c0_i32, %c0_i32_0 : i32, i32
  }
  func.func @transform_3(%arg0: i32, %arg1: i32) -> (i32, i32) {
    %c0_i32 = arith.constant 0 : i32
    %c0_i32_0 = arith.constant 0 : i32
    %c0_i32_1 = arith.constant 0 : i32
    return %c0_i32, %c0_i32_0 : i32, i32
  }
  func.func @transform_4(%arg0: i32, %arg1: i32) -> (i32, i32) {
    %c0_i32 = arith.constant 0 : i32
    %c0_i32_0 = arith.constant 0 : i32
    %c0_i32_1 = arith.constant 0 : i32
    return %c0_i32, %c0_i32_0 : i32, i32
  }
  func.func @transform_5(%arg0: i32, %arg1: i32) -> (i32, i32) {
    %c0_i32 = arith.constant 0 : i32
    %c0_i32_0 = arith.constant 0 : i32
    %c0_i32_1 = arith.constant 0 : i32
    return %c0_i32, %c0_i32_0 : i32, i32
  }
  func.func @transform_6(%arg0: i32, %arg1: i32) -> (i32, i32, i32) {
    %c0_i32 = arith.constant 0 : i32
    %c0_i32_0 = arith.constant 0 : i32
    return %arg1, %arg0, %c0_i32 : i32, i32, i32
  }
  func.func @transform_7(%arg0: i32, %arg1: i32) -> (i32, i32, i32) {
    %c0_i32 = arith.constant 0 : i32
    %c0_i32_0 = arith.constant 0 : i32
    return %arg1, %arg0, %c0_i32 : i32, i32, i32
  }
}

</mosaic_0001>

<bundles_post_ra>
// kernel: custom-call.11
= control target key start
LH: loop header
LB: loop body
LE: loop exit
PB: predicated region body
PF: predicated region fallthrough
CT: control target
= control target key end

     0   :  { %5 = vsyncpa [#allocation1], 0  ;;  %s925_s0 = inlined_call_operand.hbm [shape: f32[32,32], index: 0, kind: input, shape index: {}]   ;;  %s926_s1 = inlined_call_operand.vmem [shape: f32[32,32], index: 1, kind: output, shape index: {0}]   ;;  %s927_s2 = inlined_call_operand.hbm [shape: s32[32], index: 2, kind: output, shape index: {1}]   ;;  %s928_s3 = inlined_call_operand.vmem [shape: s32[32], index: 3, kind: output, shape index: {2}]  }
   0x1   :  { %6 = vsyncpa [#allocation2], 0  ;;  %s10_s14 = sshll.u32 %s925_s0, 4  ;;  %s745_s15 = smov [#allocation0]   ;;  %s11_s14 = int_to_ptr.hbm [resolvable:$true] %s10_s14 }
   0x2   :  { %s12_s16 = sshll.u32 %s745_s15, 4  ;;  %s13_s16 = int_to_ptr.vmem [resolvable:$true] %s12_s16 }
   0x3   :  { %15 = dma.hbm_to_vmem [thread:$0]  %s11_s14, 512, %s13_s16, [#allocation1]  }
   0x4   :  { %725 = dma.done.wait [#allocation1], 512  }
   0x5   :  { %726 = vsyncadd [#allocation1], 4294966784  ;;  %v33_v0 = vlaneseq  ;;  %v746_v1 = vmov 0   ;;  %v18_v3 = vld [vmem:[#allocation0] sm:$0xff]  ;;  %v22_v4 = vld [vmem:[#allocation0 + $0x8] sm:$0xff]  ;;  %s729_s0 = smov 0  }
   0x6   :  { %32 = vst [vmem:[#allocation4] sm:$0x1] %v746_v1  ;;  %v26_v5 = vld [vmem:[#allocation0 + $0x10] sm:$0xff]  ;;  %v30_v6 = vld [vmem:[#allocation0 + $0x18] sm:$0xff] }
   0x7   :  { %v772_v2 = vshrl.u32 %v33_v0, 7  ;;  %19 = vst [vmem:[#allocation3] sm:$0xff] %v18_v3 }
   0x8   :  { %23 = vst [vmem:[#allocation3 + $0x8] sm:$0xff] %v22_v4 }
   0x9   :  { %27 = vst [vmem:[#allocation3 + $0x10] sm:$0xff] %v26_v5 }
   0xa   :  { %31 = vst [vmem:[#allocation3 + $0x18] sm:$0xff] %v30_v6 }
   0xb LB: > { %s545_s17 = sshll.u32 %s731_s0, 3  ;;  %s41_s0 = sadd.s32 1, %s731_s0   ;;  %s731_s0 = sphi %s729_s0, %s41_s0  }
   0xc   : > { %v45_v7 = vstv %s545_s17  ;;  %s43_s18 = scalar_lea.vmem [#allocation8], %s545_s17  ;;  %p38_p0 = scmp.ge.s32.totalorder %s41_s0, 4  }
   0xd   : > { %v46_v8 = vadd.s32 %v45_v7, %v772_v2  ;;  %s775_s19 = smov (%p38_p0), 0  }
   0xe   :  { %40 = sbr.rel (!%p38_p0) target bundleno = 11 (0xb), region = 131 }
   0xf   : > { %47 = vst [vmem:[%s43_s18] sm:$0xff] %v46_v8 }
  0x13 LB: > { %v58_v9 = vld [vmem:[#allocation3] sm:$0xff]  ;;  %v70_v10 = vld [vmem:[#allocation3 + $0x8] sm:$0xff]  ;;  %v781_v11 = vadd.s32 8, %v772_v2  ;;  %v784_v13 = vstv %s735_s19  ;;  %v82_v15 = vld [vmem:[#allocation3 + $0x10] sm:$0xff]  ;;  %v789_v16 = vadd.s32 16, %v772_v2  ;;  %v796_v21 = vadd.s32 24, %v772_v2  ;;  %s735_s19 = sphi %s775_s19, %s53_s19  }
  0x14   : > { %v59_v12 = vand.u32 2147483647, %v58_v9  ;;  %v71_v14 = vand.u32 2147483647, %v70_v10  ;;  %vm62_vm0 = vcmp.ge.s32.totalorder %v772_v2, %v784_v13  ;;  %v83_v19 = vand.u32 2147483647, %v82_v15 }
  0x15   : > { %vm74_vm3 = vcmp.ge.s32.totalorder %v781_v11, %v784_v13  ;;  %v94_v20 = vld [vmem:[#allocation3 + $0x18] sm:$0xff]  ;;  %vm86_vm6 = vcmp.ge.s32.totalorder %v789_v16, %v784_v13  ;;  %vm98_vm9 = vcmp.ge.s32.totalorder %v796_v21, %v784_v13  ;;  %s140_s20 = ssub.s32 128, %s735_s19  ;;  %v807_v57 = vand.u32 127, %v33_v0  ;;  %v149_v59 = vld [vmem:[#allocation4] ss:$0 sm:$0xff]  ;;  %s152_s22 = scalar_lea.vmem [#allocation3], %s735_s19 }
  0x16   : > { %vm547_vm1 = vcmp.gt.f32.partialorder %v59_v12, -inf  ;;  %v95_v24 = vand.u32 2147483647, %v94_v20  ;;  %v154_v60 = vld [vmem:[%s152_s22] ss:$0 sm:$0xff]  ;;  %s158_s24 = scalar_lea.vmem [#allocation8], %s735_s19 }
  0x17   : > { %vm66_vm2 = vmand %vm62_vm0, %vm547_vm1  ;;  %v160_v1 = vld [vmem:[%s158_s24] ss:$0 sm:$0xff]  ;;  %s53_s19 = sadd.s32 1, %s735_s19  }
  0x18   : > { %v67_v17 = vsel %vm66_vm2, %v772_v2, %v784_v13  ;;  %v68_v18 = vsel %vm66_vm2, %v59_v12, -inf  ;;  %p50_p1 = scmp.ge.s32.totalorder %s53_s19, 32  }
  0x19   : > { %vm77_vm4 = vcmp.lt.f32.partialorder %v68_v18, %v71_v14  ;;  %s737_s28 = smov (%p50_p1), %s926_s1   ;;  %s741_s29 = smov (%p50_p1), [#allocation3]  }
  0x1a   : > { %vm78_vm5 = vmand %vm74_vm3, %vm77_vm4  ;;  %vm811_vm3 = vcmp.eq.s32.totalorder %v807_v57, %v784_v13 }
  0x1b   : > { %v79_v22 = vsel %vm78_vm5, %v781_v11, %v67_v17  ;;  %v80_v23 = vsel %vm78_vm5, %v71_v14, %v68_v18  ;;  %vm262_vm5 = vcmp.gt.s32.totalorder %v796_v21, %v784_v13 }
  0x1c   : > { %vm89_vm7 = vcmp.lt.f32.partialorder %v80_v23, %v83_v19 }
  0x1d   : > { %vm90_vm8 = vmand %vm86_vm6, %vm89_vm7  ;;  %vm206_vm6 = vcmp.gt.s32.totalorder %v781_v11, %v784_v13  ;;  %vm178_vm7 = vcmp.gt.s32.totalorder %v772_v2, %v784_v13 }
  0x1e   : > { %v91_v25 = vsel %vm90_vm8, %v789_v16, %v79_v22  ;;  %v92_v26 = vsel %vm90_vm8, %v83_v19, %v80_v23 }
  0x1f   : > { %vm101_vm10 = vcmp.lt.f32.partialorder %v92_v26, %v95_v24 }
  0x20   : > { %vm102_vm11 = vmand %vm98_vm9, %vm101_vm10  ;;  %vm929_vm9 = vcmp.gt.s32.totalorder %v789_v16, %v784_v13 }
  0x21   : > { %v103_v27 = vsel %vm102_vm11, %v796_v21, %v91_v25  ;;  %v104_v28 = vsel %vm102_vm11, %v95_v24, %v92_v26 }
  0x22   : > { %v105_v29 = vrot.slane %v104_v28, 1  ;;  %v106_v30 = vrot.slane %v103_v27, 1 }
  0x24   : > { %vm107_vm12 = vcmp.ge.f32.partialorder %v105_v29, %v104_v28  ;;  %v110_v31 = vrot.slane %v105_v29, 1  ;;  %v111_v32 = vrot.slane %v106_v30, 1 }
  0x25   : > { %v108_v33 = vsel %vm107_vm12, %v105_v29, %v104_v28  ;;  %v109_v34 = vsel %vm107_vm12, %v106_v30, %v103_v27 }
  0x26   : > { %vm112_vm13 = vcmp.ge.f32.partialorder %v110_v31, %v108_v33  ;;  %v115_v35 = vrot.slane %v110_v31, 1  ;;  %v116_v36 = vrot.slane %v111_v32, 1 }
  0x27   : > { %v113_v37 = vsel %vm112_vm13, %v110_v31, %v108_v33  ;;  %v114_v38 = vsel %vm112_vm13, %v111_v32, %v109_v34 }
  0x28   : > { %vm117_vm14 = vcmp.ge.f32.partialorder %v115_v35, %v113_v37  ;;  %v120_v39 = vrot.slane %v115_v35, 1  ;;  %v121_v40 = vrot.slane %v116_v36, 1 }
  0x29   : > { %v118_v41 = vsel %vm117_vm14, %v115_v35, %v113_v37  ;;  %v119_v42 = vsel %vm117_vm14, %v116_v36, %v114_v38 }
  0x2a   : > { %vm122_vm15 = vcmp.ge.f32.partialorder %v120_v39, %v118_v41  ;;  %v125_v43 = vrot.slane %v120_v39, 1  ;;  %v126_v44 = vrot.slane %v121_v40, 1 }
  0x2b   : > { %v123_v45 = vsel %vm122_vm15, %v120_v39, %v118_v41  ;;  %v124_v46 = vsel %vm122_vm15, %v121_v40, %v119_v42 }
  0x2c   : > { %vm127_vm0 = vcmp.ge.f32.partialorder %v125_v43, %v123_v45  ;;  %v130_v47 = vrot.slane %v125_v43, 1  ;;  %v131_v48 = vrot.slane %v126_v44, 1 }
  0x2d   : > { %v128_v49 = vsel %vm127_vm0, %v125_v43, %v123_v45  ;;  %v129_v50 = vsel %vm127_vm0, %v126_v44, %v124_v46  ;;  %vm863_vm0 = vmand %vm262_vm5, %vm811_vm3 }
  0x2e   : > { %vm132_vm1 = vcmp.ge.f32.partialorder %v130_v47, %v128_v49  ;;  %v135_v51 = vrot.slane %v130_v47, 1  ;;  %v136_v52 = vrot.slane %v131_v48, 1 }
  0x2f   : > { %v133_v53 = vsel %vm132_vm1, %v130_v47, %v128_v49  ;;  %v134_v54 = vsel %vm132_vm1, %v131_v48, %v129_v50 }
  0x30   : > { %vm137_vm2 = vcmp.ge.f32.partialorder %v135_v51, %v133_v53 }
  0x31   : > { %v139_v55 = vsel %vm137_vm2, %v136_v52, %v134_v54  ;;  %vm872_vm2 = vmand %vm206_vm6, %vm811_vm3 }
  0x32   : > { %141 = vrot.lane.b32.xlu0 %v139_v55, %s140_s20 }
  0xa4   : > { %v142_v56 = vpop.permute.xlu0 %141 }
  0xa5   : > { %555 = vpush %v142_v56 }
  0xd6   : > { %s556_s21 = spop %555 }
  0xd7   : > { %v148_v61 = vstv %s556_s21  ;;  %s153_s23 = scalar_lea.vmem [#allocation3], %s556_s21  ;;  %s159_s25 = scalar_lea.vmem [#allocation8], %s556_s21 }
  0xd8   : > { %v150_v62 = vsel %vm811_vm3, %v148_v61, %v149_v59  ;;  %v818_v63 = vld [vmem:[%s153_s23] ss:$0 sm:$0xff] }
  0xd9   : > { %151 = vst [vmem:[#allocation4] sm:$0x1] %v150_v62  ;;  %v161_v3 = vld [vmem:[%s159_s25] ss:$0 sm:$0xff]  ;;  %vm164_vm4 = vcmp.ne.f32.partialorder %v818_v63, 0.0 }
  0xda   : > { %156 = vst [vmem:[%s153_s23] sm:$0x1] %v154_v60  ;;  %vm165_vm8 = vmand %vm811_vm3, %vm164_vm4 }
  0xdb   : > { %157 = vst [vmem:[%s152_s22] sm:$0x1] %v818_v63  ;;  %v166_v4 = vsel %vm165_vm8, %v818_v63, 1.0 }
  0xdc   : > { %162 = vst [vmem:[%s159_s25] sm:$0x1] %v160_v1  ;;  %v263_v5 = vsel %vm262_vm5, %v166_v4, 1.0  ;;  %v207_v6 = vsel %vm206_vm6, %v166_v4, 1.0  ;;  %v179_v7 = vsel %vm178_vm7, %v166_v4, 1.0  ;;  %v846_v8 = vsel %vm929_vm9, %v166_v4, 1.0 }
  0xdd   : > { %163 = vst [vmem:[%s158_s24] sm:$0x1] %v161_v3  ;;  %633 = vrcp.f32 %v263_v5  ;;  %v273_v9 = vand.u32 2147483647, %v263_v5  ;;  %v275_v10 = vand.u32 2147483648, %v263_v5  ;;  %v217_v14 = vand.u32 2147483647, %v207_v6 }
  0xde   : > { %635 = vrcp.f32 %v207_v6  ;;  %v219_v15 = vand.u32 2147483648, %v207_v6  ;;  %vm269_vm10 = vweird.f32 %v263_v5  ;;  %vm213_vm11 = vweird.f32 %v207_v6 }
  0xdf   : > { %637 = vrcp.f32 %v179_v7  ;;  %vm849_vm12 = vcmp.eq.f32.partialorder %v273_v9, 8.507059e+37  ;;  %v276_v24 = vor.u32 1.1754944e-38, %v275_v10  ;;  %vm853_vm13 = vcmp.eq.f32.partialorder %v217_v14, 8.507059e+37 }
  0xe0   : > { %639 = vrcp.f32 %v846_v8  ;;  %v220_v29 = vor.u32 1.1754944e-38, %v219_v15  ;;  %vm185_vm14 = vweird.f32 %v179_v7  ;;  %v189_v35 = vand.u32 2147483647, %v179_v7 }
  0xe1   : > { %v191_v36 = vand.u32 2147483648, %v179_v7  ;;  %vm241_vm8 = vweird.f32 %v846_v8  ;;  %v245_v41 = vand.u32 2147483647, %v846_v8  ;;  %v247_v42 = vand.u32 2147483648, %v846_v8 }
  0xe2   : > { %v259_v45 = vld [vmem:[#allocation3 + $0x18] sm:$0xff]  ;;  %v203_v50 = vld [vmem:[#allocation3 + $0x8] sm:$0xff]  ;;  %v175_v56 = vld [vmem:[#allocation3] sm:$0xff] }
  0xe3   : > { %v634_v12 = vpop.eup %633  ;;  %v192_v48 = vor.u32 1.1754944e-38, %v191_v36  ;;  %v248_v1 = vor.u32 1.1754944e-38, %v247_v42 }
  0xe4   : > { %v636_v17 = vpop.eup %635  ;;  %v265_v18 = vmul.f32 %v634_v12, %v263_v5  ;;  %vm270_vm15 = vweird.f32 %v634_v12 }
  0xe5   : > { %v638_v19 = vpop.eup %637  ;;  %v209_v20 = vmul.f32 %v636_v17, %v207_v6  ;;  %vm214_vm1 = vweird.f32 %v636_v17  ;;  %vm271_vm5 = vmor %vm269_vm10, %vm270_vm15  ;;  %vm190_vm15 = vcmp.eq.f32.partialorder %v189_v35, 8.507059e+37  ;;  %v231_v6 = vld [vmem:[#allocation3 + $0x10] sm:$0xff] }
  0xe6   : > { %v266_v22 = vsub.f32 1.0, %v265_v18  ;;  %v181_v25 = vmul.f32 %v638_v19, %v179_v7  ;;  %v640_v26 = vpop.eup %639  ;;  %vm186_vm4 = vweird.f32 %v638_v19  ;;  %vm215_vm9 = vmor %vm213_vm11, %vm214_vm1 }
  0xe7   : > { %v210_v27 = vsub.f32 1.0, %v209_v20  ;;  %v237_v32 = vmul.f32 %v640_v26, %v846_v8  ;;  %vm242_vm6 = vweird.f32 %v640_v26  ;;  %vm187_vm10 = vmor %vm185_vm14, %vm186_vm4  ;;  %vm170_vm14 = vcmp.gt.s32.totalorder %v807_v57, %v784_v13  ;;  %v288_v57 = vld [vmem:[#allocation8 + $0x8] sm:$0xff] (%p50_p1) }
  0xe8   : > { %v267_v30 = vmul.f32 %v634_v12, %v266_v22  ;;  %v182_v31 = vsub.f32 1.0, %v181_v25  ;;  %vm892_vm11 = vmand %vm178_vm7, %vm811_vm3  ;;  %vm246_vm7 = vcmp.eq.f32.partialorder %v245_v41, 8.507059e+37  ;;  %v171_v9 = vsel %vm170_vm14, %v818_v63, 0.0  ;;  %v290_v63 = vld [vmem:[#allocation8 + $0x10] sm:$0xff] (%p50_p1)  ;;  %v340_v25 = vld [vmem:[#allocation4] sm:$0x1] (%p50_p1) }
  0xe9   : > { %v211_v34 = vmul.f32 %v636_v17, %v210_v27  ;;  %v238_v21 = vsub.f32 1.0, %v237_v32  ;;  %343 = vst [vmem:[#allocation5] sm:$0x1] (%p50_p1), %v340_v25 }
  0xea   : > { %v268_v37 = vadd.f32 %v634_v12, %v267_v30  ;;  %v183_v39 = vmul.f32 %v638_v19, %v182_v31 }
  0xeb   : > { %v212_v40 = vadd.f32 %v636_v17, %v211_v34  ;;  %v239_v44 = vmul.f32 %v640_v26, %v238_v21 }
  0xec   : > { %v272_v43 = vsel %vm271_vm5, %v634_v12, %v268_v37  ;;  %v184_v11 = vadd.f32 %v638_v19, %v183_v39 }
  0xed   : > { %v277_v46 = vsel %vm849_vm12, %v276_v24, %v272_v43  ;;  %v216_v47 = vsel %vm215_vm9, %v636_v17, %v212_v40  ;;  %v240_v54 = vadd.f32 %v640_v26, %v239_v44  ;;  %vm243_vm9 = vmor %vm241_vm8, %vm242_vm6  ;;  %vm942_vm12 = vcmp.gt.s32.totalorder %v789_v16, %v784_v13  ;;  %v286_v13 = vld [vmem:[#allocation8] sm:$0xff] (%p50_p1)  ;;  %v292_v24 = vld [vmem:[#allocation8 + $0x18] sm:$0xff] (%p50_p1) }
  0xee   : > { %v278_v49 = vmul.f32 %v277_v46, %v259_v45  ;;  %v221_v51 = vsel %vm853_vm13, %v220_v29, %v216_v47  ;;  %v188_v52 = vsel %vm187_vm10, %v638_v19, %v184_v11  ;;  %vm251_vm13 = vmand %vm942_vm12, %vm811_vm3 }
  0xef   : > { %v222_v55 = vmul.f32 %v221_v51, %v203_v50  ;;  %v193_v59 = vsel %vm190_vm15, %v192_v48, %v188_v52  ;;  %v244_v62 = vsel %vm243_vm9, %v640_v26, %v240_v54 }
  0xf0   : > { %v280_v60 = vsel %vm863_vm0, %v278_v49, 0.0  ;;  %v194_v61 = vmul.f32 %v193_v59, %v175_v56  ;;  %v249_v5 = vsel %vm246_vm7, %v248_v1, %v244_v62 }
  0xf1   : > { %281 = vadd.xlane.f32.xlu2 %v280_v60  ;;  %v224_v3 = vsel %vm872_vm2, %v222_v55, 0.0  ;;  %v250_v7 = vmul.f32 %v249_v5, %v231_v6 }
  0xf2   : > { %225 = vadd.xlane.f32.xlu1 %v224_v3  ;;  %v196_v4 = vsel %vm892_vm11, %v194_v61, 0.0 }
  0xf3   : > { %197 = vadd.xlane.f32.xlu0 %v196_v4  ;;  %v252_v8 = vsel %vm251_vm13, %v250_v7, 0.0 }
  0xfa   : > { %253 = vadd.xlane.f32.xlu1 %v252_v8 }
 0x11c   :  { %305 = vxpose.xlu0.b32.start [1/4] (short) (narrow) (%p50_p1), %v286_v13, 8 }
 0x124   :  { %306 = vxpose.xlu0.b32.cont [2/4] (short) (narrow) (%p50_p1), %v288_v57, 8 }
 0x12c   :  { %307 = vxpose.xlu0.b32.cont [3/4] (short) (narrow) (%p50_p1), %v290_v63, 8 }
 0x134   :  { %308 = vxpose.xlu0.b32.end [4/4] (short) (narrow) (%p50_p1), %v292_v24, 8 }
 0x164   : > { %v282_v10 = vpop.xlane.xlu2 %281 }
 0x165   : > { %v283_v12 = vmul.f32 %v282_v10, %v171_v9  ;;  %v226_v14 = vpop.xlane.xlu1 %225 }
 0x166   : > { %v227_v15 = vmul.f32 %v226_v14, %v171_v9  ;;  %v198_v17 = vpop.xlane.xlu0 %197 }
 0x167   : > { %v284_v18 = vsub.f32 %v278_v49, %v283_v12  ;;  %v199_v19 = vmul.f32 %v198_v17, %v171_v9 }
 0x168   : > { %v228_v20 = vsub.f32 %v222_v55, %v227_v15 }
 0x169   : > { %285 = vst [vmem:[#allocation3 + $0x18] sm:$0xff] %v284_v18  ;;  %v200_v58 = vsub.f32 %v194_v61, %v199_v19 }
 0x16a   : > { %229 = vst [vmem:[#allocation3 + $0x8] sm:$0xff] %v228_v20 }
 0x16b   : > { %201 = vst [vmem:[#allocation3] sm:$0xff] %v200_v58 }
 0x16d   : > { %v254_v16 = vpop.xlane.xlu1 %253 }
 0x16e   : > { %v255_v22 = vmul.f32 %v254_v16, %v171_v9 }
 0x170   : > { %v256_v23 = vsub.f32 %v250_v7, %v255_v22  ;;  %52 = sbr.rel (!%p50_p1) target bundleno = 19 (0x13), region = 142 }
 0x172   : > { %257 = vst [vmem:[#allocation3 + $0x10] sm:$0xff] %v256_v23 }
 0x1c0   :  { %v321_v26 = vpop.trf.xlu0 }
 0x1c1   :  { %337 = vst [vmem:[#allocation6] sm:$0x1] %v321_v26 }
 0x1c8   :  { %v346_v27 = vld [vmem:[#allocation6] sm:$0x1] }
 0x1c9   :  { %349 = vst [vmem:[#allocation7] sm:$0x1] %v346_v27 }
 0x1ca LB: > { %v393_v0 = vld [vmem:[%s743_s29] sm:$0xff]  ;;  %s395_s29 = scalar_lea.vmem %s743_s29, 8   ;;  %s743_s29 = sphi %s741_s29, %s395_s29   ;;  %s739_s28 = sphi %s737_s28, %s396_s28  }
 0x1cb   : > { %394 = vst [vmem:[%s739_s28] sm:$0xff] %v393_v0  ;;  %s396_s28 = scalar_lea.vmem %s739_s28, 8   ;;  %p390_p2 = scmp.gt.s32.totalorder %s395_s29, [#allocation3 + $0x18] }
 0x1cc   :  { %s413_s5 = sshll.u32 (%p390_p2), %s927_s2, 4  ;;  %s747_s6 = smov (%p390_p2), [#allocation5]   ;;  %s414_s5 = int_to_ptr.hbm [resolvable:$true] %s413_s5 }
 0x1cd   :  { %392 = sbr.rel (!%p390_p2) target bundleno = 458 (0x1ca), region = 164  ;;  %s411_s1 = sshll.u32 (%p390_p2), %s747_s6, 4  ;;  %s412_s1 = int_to_ptr.vmem [resolvable:$true] %s411_s1 }
 0x1ce   :  { %416 = dma.vmem_to_hbm [thread:$0]  (%p390_p2), %s412_s1, 16, %s414_s5, [#allocation2]  }
 0x1d0   :  { %v473_v2 = vld [vmem:[#allocation7] sm:$0x1] (%p390_p2) }
 0x1d1   :  { %474 = vst [vmem:[%s928_s3] sm:$0x1] (%p390_p2), %v473_v2 }
 0x1d2   :  { %727 = dma.done.wait [#allocation2], 16  }
 0x1d3   :  { %728 = vsyncadd [#allocation2], 4294967280 }
 0x1d4   :  { %481 = vsyncpa [#allocation1], 1 }
 0x1d5   :  { %482 = vsyncpa [#allocation2], 1 }

// kernel: custom-call.12
= control target key start
LH: loop header
LB: loop body
LE: loop exit
PB: predicated region body
PF: predicated region fallthrough
CT: control target
= control target key end

     0   :  { %v47_v0 = vlaneseq  ;;  %v835_v19 = vmov -1.0   ;;  %s1141_s0 = inlined_call_operand.vmem [shape: f32[1,32,32], index: 0, kind: input, shape index: {}]   ;;  %s1142_s1 = inlined_call_operand.vmem [shape: f32[1,32,32], index: 1, kind: output, shape index: {}]  }
   0x1   :  { %v42_v3 = vld [vmem:[%s1141_s0 + $0x18] sm:$0xff]  ;;  %v40_v35 = vld [vmem:[%s1141_s0 + $0x10] sm:$0xff] }
   0x2   :  { %v847_v1 = vand.u32 127, %v47_v0  ;;  %v849_v2 = vshrl.u32 %v47_v0, 7 }
   0x4   :  { %v139_v4 = vadd.s32 24, %v849_v2  ;;  %vm49_vm1 = vcmp.lt.s32.totalorder %v847_v1, 32  ;;  %vm193_vm8 = vcmp.eq.s32.totalorder %v847_v1, 31  ;;  %vm201_vm10 = vcmp.eq.s32.totalorder %v847_v1, 30 }
   0x5   :  { %v194_v20 = vsel %vm193_vm8, 1.0, %v835_v19  ;;  %vm211_vm11 = vcmp.eq.s32.totalorder %v847_v1, 29  ;;  %v110_v36 = vadd.s32 16, %v849_v2  ;;  %vm221_vm13 = vcmp.eq.s32.totalorder %v847_v1, 28 }
   0x6   :  { %vm140_vm0 = vcmp.eq.s32.totalorder %v139_v4, %v847_v1  ;;  %vm145_vm2 = vcmp.le.s32.totalorder %v139_v4, %v847_v1  ;;  %vm190_vm9 = vcmp.eq.s32.totalorder %v847_v1, %v139_v4 }
   0x7   :  { %v142_v5 = vsel %vm140_vm0, %v42_v3, 0.0  ;;  %vm146_vm3 = vmand %vm145_vm2, %vm49_vm1  ;;  %v195_v21 = vsel %vm190_vm9, %v194_v20, 0.0  ;;  %vm111_vm12 = vcmp.eq.s32.totalorder %v110_v36, %v847_v1  ;;  %vm116_vm14 = vcmp.le.s32.totalorder %v110_v36, %v847_v1 }
   0x8   :  { %143 = vadd.xlane.f32.xlu0 %v142_v5  ;;  %v147_v14 = vsel %vm146_vm3, %v42_v3, 0.0  ;;  %v113_v37 = vsel %vm111_vm12, %v40_v35, 0.0  ;;  %vm117_vm2 = vmand %vm116_vm14, %vm49_vm1  ;;  %vm183_vm8 = vcmp.eq.s32.totalorder %v847_v1, %v110_v36  ;;  %vm251_vm9 = vcmp.eq.s32.totalorder %v847_v1, 25 }
   0x9   :  { %v118_v52 = vsel %vm117_vm2, %v40_v35, 0.0  ;;  %vm285_vm12 = vcmp.eq.s32.totalorder %v847_v1, 22  ;;  %vm313_vm14 = vcmp.eq.s32.totalorder %v847_v1, 20  ;;  %vm341_vm2 = vcmp.eq.s32.totalorder %v847_v1, 18 }
  0x7b   :  { %v856_v6 = vpop.xlane.xlu0 %143 }
  0x7c   :  { %827 = vrcp.f32 %v856_v6  ;;  %v159_v10 = vand.u32 2147483648, %v856_v6  ;;  %v157_v12 = vand.u32 2147483647, %v856_v6  ;;  %vm153_vm5 = vweird.f32 %v856_v6 }
  0x7e   :  { %v160_v15 = vor.u32 1.1754944e-38, %v159_v10  ;;  %vm158_vm7 = vcmp.eq.f32.partialorder %v157_v12, 8.507059e+37 }
  0x82   :  { %v828_v7 = vpop.eup %827 }
  0x83   :  { %v149_v8 = vmul.f32 %v828_v7, %v856_v6  ;;  %vm154_vm4 = vweird.f32 %v828_v7 }
  0x84   :  { %vm155_vm6 = vmor %vm153_vm5, %vm154_vm4 }
  0x85   :  { %v150_v9 = vsub.f32 1.0, %v149_v8 }
  0x87   :  { %v151_v11 = vmul.f32 %v828_v7, %v150_v9 }
  0x89   :  { %v152_v13 = vadd.f32 %v828_v7, %v151_v11 }
  0x8b   :  { %v156_v16 = vsel %vm155_vm6, %v828_v7, %v152_v13  ;;  %vm231_vm6 = vcmp.eq.s32.totalorder %v847_v1, 27  ;;  %v836_v7 = vmov 0.0  }
  0x8c   :  { %v869_v17 = vsel %vm158_vm7, %v160_v15, %v156_v16  ;;  %vm241_vm7 = vcmp.eq.s32.totalorder %v847_v1, 26  ;;  %v184_v8 = vsel %vm183_vm8, -1.0, %v836_v7 }
  0x8d   :  { %v162_v18 = vmul.f32 %v869_v17, %v147_v14 }
  0x8f   :  { %163 = vst [vmem:[#allocation2 + $0x18] sm:$0xff] %v162_v18 }
  0x96   :  { %v197_v22 = vld [vmem:[#allocation2 + $0x1e] ss:$0 sm:$0xff]  ;;  %v207_v25 = vld [vmem:[#allocation2 + $0x1d] ss:$0 sm:$0xff]  ;;  %v217_v30 = vld [vmem:[#allocation2 + $0x1c] ss:$0 sm:$0xff] }
  0x97   :  { %v198_v23 = vxor.u32 2147483648, %v197_v22  ;;  %v208_v27 = vxor.u32 2147483648, %v207_v25  ;;  %v218_v32 = vxor.u32 2147483648, %v217_v30  ;;  %v227_v38 = vld [vmem:[#allocation2 + $0x1b] ss:$0 sm:$0xff] }
  0x98   :  { %v228_v40 = vxor.u32 2147483648, %v227_v38  ;;  %v237_v56 = vld [vmem:[#allocation2 + $0x1a] ss:$0 sm:$0xff]  ;;  %v247_v61 = vld [vmem:[#allocation2 + $0x19] ss:$0 sm:$0xff] }
  0x99   :  { %v202_v24 = vmul.f32 %v198_v23, %v195_v21  ;;  %v238_v58 = vxor.u32 2147483648, %v237_v56  ;;  %v248_v63 = vxor.u32 2147483648, %v247_v61  ;;  %v257_v10 = vld [vmem:[#allocation2 + $0x18] ss:$0 sm:$0xff] }
  0x9a   :  { %v258_v12 = vxor.u32 2147483648, %v257_v10 }
  0x9b   :  { %203 = vadd.xlane.f32.xlu0 %v202_v24 }
 0x10e   :  { %v204_v26 = vpop.xlane.xlu0 %203 }
 0x10f   :  { %v205_v28 = vsel %vm201_vm10, %v204_v26, %v195_v21  ;;  %vm271_vm10 = vcmp.eq.s32.totalorder %v847_v1, 23 }
 0x110   :  { %v212_v29 = vmul.f32 %v208_v27, %v205_v28 }
 0x112   :  { %213 = vadd.xlane.f32.xlu1 %v212_v29 }
 0x185   :  { %v214_v31 = vpop.xlane.xlu1 %213 }
 0x186   :  { %v215_v33 = vsel %vm211_vm11, %v214_v31, %v205_v28  ;;  %vm261_vm11 = vcmp.eq.s32.totalorder %v847_v1, 24 }
 0x187   :  { %v222_v34 = vmul.f32 %v218_v32, %v215_v33 }
 0x189   :  { %223 = vadd.xlane.f32.xlu1 %v222_v34 }
 0x191   :  { %114 = vadd.xlane.f32.xlu1 %v113_v37 }
 0x1fc   :  { %v224_v39 = vpop.xlane.xlu1 %223 }
 0x1fd   :  { %v225_v41 = vsel %vm221_vm13, %v224_v39, %v215_v33  ;;  %vm299_vm13 = vcmp.eq.s32.totalorder %v847_v1, 21 }
 0x1fe   :  { %v232_v42 = vmul.f32 %v228_v40, %v225_v41 }
 0x200   :  { %233 = vadd.xlane.f32.xlu2 %v232_v42 }
 0x204   :  { %v882_v43 = vpop.xlane.xlu1 %114 }
 0x205   :  { %829 = vrcp.f32 %v882_v43  ;;  %v130_v46 = vand.u32 2147483648, %v882_v43  ;;  %vm124_vm15 = vweird.f32 %v882_v43  ;;  %v128_v48 = vand.u32 2147483647, %v882_v43 }
 0x207   :  { %v131_v50 = vor.u32 1.1754944e-38, %v130_v46  ;;  %vm129_vm4 = vcmp.eq.f32.partialorder %v128_v48, 8.507059e+37 }
 0x20b   :  { %v830_v44 = vpop.eup %829 }
 0x20c   :  { %v120_v45 = vmul.f32 %v830_v44, %v882_v43  ;;  %vm125_vm0 = vweird.f32 %v830_v44 }
 0x20d   :  { %vm126_vm3 = vmor %vm124_vm15, %vm125_vm0  ;;  %vm327_vm0 = vcmp.eq.s32.totalorder %v847_v1, 19 }
 0x20e   :  { %v121_v47 = vsub.f32 1.0, %v120_v45 }
 0x210   :  { %v122_v49 = vmul.f32 %v830_v44, %v121_v47 }
 0x212   :  { %v123_v51 = vadd.f32 %v830_v44, %v122_v49 }
 0x214   :  { %v127_v53 = vsel %vm126_vm3, %v830_v44, %v123_v51  ;;  %vm355_vm3 = vcmp.eq.s32.totalorder %v847_v1, 17 }
 0x215   :  { %v894_v54 = vsel %vm129_vm4, %v131_v50, %v127_v53 }
 0x216   :  { %v133_v55 = vmul.f32 %v894_v54, %v118_v52 }
 0x218   :  { %134 = vst [vmem:[#allocation2 + $0x10] sm:$0xff] %v133_v55 }
 0x21f   :  { %v267_v3 = vld [vmem:[#allocation2 + $0x17] ss:$0 sm:$0xff]  ;;  %v281_v15 = vld [vmem:[#allocation2 + $0x16] ss:$0 sm:$0xff]  ;;  %v295_v24 = vld [vmem:[#allocation2 + $0x15] ss:$0 sm:$0xff] }
 0x220   :  { %v268_v5 = vxor.u32 2147483648, %v267_v3  ;;  %v282_v16 = vxor.u32 2147483648, %v281_v15  ;;  %v296_v26 = vxor.u32 2147483648, %v295_v24  ;;  %v309_v32 = vld [vmem:[#allocation2 + $0x14] ss:$0 sm:$0xff] }
 0x221   :  { %v310_v34 = vxor.u32 2147483648, %v309_v32  ;;  %v323_v40 = vld [vmem:[#allocation2 + $0x13] ss:$0 sm:$0xff]  ;;  %v337_v49 = vld [vmem:[#allocation2 + $0x12] ss:$0 sm:$0xff] }
 0x222   :  { %v272_v9 = vmul.f32 %v268_v5, %v184_v8  ;;  %v324_v42 = vxor.u32 2147483648, %v323_v40  ;;  %v338_v51 = vxor.u32 2147483648, %v337_v49 }
 0x273   :  { %v234_v57 = vpop.xlane.xlu2 %233 }
 0x274   :  { %v235_v59 = vsel %vm231_vm6, %v234_v57, %v225_v41 }
 0x275   :  { %v242_v60 = vmul.f32 %v238_v58, %v235_v59  ;;  %v351_v58 = vld [vmem:[#allocation2 + $0x11] ss:$0 sm:$0xff] }
 0x277   :  { %243 = vadd.xlane.f32.xlu2 %v242_v60  ;;  %v352_v60 = vxor.u32 2147483648, %v351_v58 }
 0x2ea   :  { %v244_v62 = vpop.xlane.xlu2 %243 }
 0x2eb   :  { %v245_v0 = vsel %vm241_vm7, %v244_v62, %v235_v59 }
 0x2ec   :  { %v252_v4 = vmul.f32 %v248_v63, %v245_v0 }
 0x2ee   :  { %253 = vadd.xlane.f32.xlu0 %v252_v4  ;;  %v81_v4 = vadd.s32 8, %v849_v2 }
 0x2f0   :  { %vm82_vm4 = vcmp.eq.s32.totalorder %v81_v4, %v847_v1  ;;  %vm87_vm6 = vcmp.le.s32.totalorder %v81_v4, %v847_v1 }
 0x2f6   :  { %273 = vadd.xlane.f32.xlu0 %v272_v9 }
 0x361   :  { %v254_v11 = vpop.xlane.xlu0 %253 }
 0x362   :  { %v255_v13 = vsel %vm251_vm9, %v254_v11, %v245_v0  ;;  %vm88_vm9 = vmand %vm87_vm6, %vm49_vm1  ;;  %vm473_vm6 = vcmp.eq.s32.totalorder %v847_v1, 10 }
 0x363   :  { %v262_v14 = vmul.f32 %v258_v12, %v255_v13 }
 0x365   :  { %263 = vadd.xlane.f32.xlu2 %v262_v14 }
 0x369   :  { %v274_v18 = vpop.xlane.xlu0 %273 }
 0x36a   :  { %v275_v19 = vsel %vm271_vm10, %v274_v18, %v184_v8  ;;  %v38_v8 = vld [vmem:[%s1141_s0 + $0x8] sm:$0xff] }
 0x36b   :  { %v286_v20 = vmul.f32 %v282_v16, %v275_v19  ;;  %v84_v12 = vsel %vm82_vm4, %v38_v8, 0.0  ;;  %vm455_vm4 = vcmp.eq.s32.totalorder %v847_v1, 11 }
 0x36d   :  { %287 = vadd.xlane.f32.xlu2 %v286_v20 }
 0x3d8   :  { %v264_v21 = vpop.xlane.xlu2 %263 }
 0x3d9   :  { %v265_v22 = vsel %vm261_vm11, %v264_v21, %v255_v13 }
 0x3da   :  { %v276_v23 = vmul.f32 %v268_v5, %v265_v22  ;;  %v365_v5 = vld [vmem:[#allocation2 + $0x10] ss:$0 sm:$0xff] }
 0x3db   :  { %v366_v10 = vxor.u32 2147483648, %v365_v5 }
 0x3dc   :  { %277 = vadd.xlane.f32.xlu1 %v276_v23 }
 0x3e0   :  { %v288_v25 = vpop.xlane.xlu2 %287 }
 0x3e1   :  { %v289_v27 = vsel %vm285_vm12, %v288_v25, %v275_v19 }
 0x3e2   :  { %v300_v28 = vmul.f32 %v296_v26, %v289_v27 }
 0x3e4   :  { %301 = vadd.xlane.f32.xlu1 %v300_v28 }
 0x44f   :  { %v278_v29 = vpop.xlane.xlu1 %277 }
 0x450   :  { %v279_v30 = vsel %vm271_vm10, %v278_v29, %v265_v22 }
 0x451   :  { %v290_v31 = vmul.f32 %v282_v16, %v279_v30 }
 0x453   :  { %291 = vadd.xlane.f32.xlu0 %v290_v31 }
 0x457   :  { %v302_v33 = vpop.xlane.xlu1 %301 }
 0x458   :  { %v303_v35 = vsel %vm299_vm13, %v302_v33, %v289_v27  ;;  %v89_v27 = vsel %vm88_vm9, %v38_v8, 0.0  ;;  %vm491_vm9 = vcmp.eq.s32.totalorder %v847_v1, 9 }
 0x459   :  { %v314_v36 = vmul.f32 %v310_v34, %v303_v35 }
 0x45b   :  { %315 = vadd.xlane.f32.xlu0 %v314_v36 }
 0x4c6   :  { %v292_v37 = vpop.xlane.xlu0 %291 }
 0x4c7   :  { %v293_v38 = vsel %vm285_vm12, %v292_v37, %v279_v30  ;;  %vm176_vm12 = vcmp.eq.s32.totalorder %v847_v1, %v81_v4 }
 0x4c8   :  { %v304_v39 = vmul.f32 %v296_v26, %v293_v38  ;;  %v177_v33 = vsel %vm176_vm12, -1.0, %v836_v7 }
 0x4ca   :  { %305 = vadd.xlane.f32.xlu2 %v304_v39 }
 0x4ce   :  { %v316_v41 = vpop.xlane.xlu0 %315 }
 0x4cf   :  { %v317_v44 = vsel %vm313_vm14, %v316_v41, %v303_v35 }
 0x4d0   :  { %v328_v45 = vmul.f32 %v324_v42, %v317_v44 }
 0x4d2   :  { %329 = vadd.xlane.f32.xlu2 %v328_v45 }
 0x53d   :  { %v306_v46 = vpop.xlane.xlu2 %305 }
 0x53e   :  { %v307_v47 = vsel %vm299_vm13, %v306_v46, %v293_v38  ;;  %vm369_vm13 = vcmp.eq.s32.totalorder %v847_v1, 16 }
 0x53f   :  { %v318_v48 = vmul.f32 %v310_v34, %v307_v47 }
 0x541   :  { %319 = vadd.xlane.f32.xlu1 %v318_v48 }
 0x545   :  { %v330_v50 = vpop.xlane.xlu2 %329 }
 0x546   :  { %v331_v52 = vsel %vm327_vm0, %v330_v50, %v317_v44 }
 0x547   :  { %v342_v53 = vmul.f32 %v338_v51, %v331_v52 }
 0x549   :  { %343 = vadd.xlane.f32.xlu1 %v342_v53 }
 0x5b4   :  { %v320_v55 = vpop.xlane.xlu1 %319 }
 0x5b5   :  { %v321_v56 = vsel %vm313_vm14, %v320_v55, %v307_v47  ;;  %vm383_vm14 = vcmp.eq.s32.totalorder %v847_v1, 15 }
 0x5b6   :  { %v332_v57 = vmul.f32 %v324_v42, %v321_v56 }
 0x5b8   :  { %333 = vadd.xlane.f32.xlu0 %v332_v57 }
 0x5bc   :  { %v344_v59 = vpop.xlane.xlu1 %343 }
 0x5bd   :  { %v345_v61 = vsel %vm341_vm2, %v344_v59, %v331_v52 }
 0x5be   :  { %v356_v62 = vmul.f32 %v352_v60, %v345_v61 }
 0x5c0   :  { %357 = vadd.xlane.f32.xlu0 %v356_v62 }
 0x62b   :  { %v334_v63 = vpop.xlane.xlu0 %333 }
 0x62c   :  { %v335_v0 = vsel %vm327_vm0, %v334_v63, %v321_v56  ;;  %vm401_vm0 = vcmp.eq.s32.totalorder %v847_v1, 14 }
 0x62d   :  { %v346_v3 = vmul.f32 %v338_v51, %v335_v0 }
 0x62f   :  { %347 = vadd.xlane.f32.xlu2 %v346_v3 }
 0x633   :  { %v358_v9 = vpop.xlane.xlu0 %357 }
 0x634   :  { %v359_v11 = vsel %vm355_vm3, %v358_v9, %v345_v61 }
 0x635   :  { %v370_v13 = vmul.f32 %v366_v10, %v359_v11 }
 0x637   :  { %371 = vadd.xlane.f32.xlu0 %v370_v13  ;;  %85 = vadd.xlane.f32.xlu2 %v84_v12 }
 0x6a2   :  { %v348_v14 = vpop.xlane.xlu2 %347 }
 0x6a3   :  { %v349_v15 = vsel %vm341_vm2, %v348_v14, %v335_v0  ;;  %vm419_vm2 = vcmp.eq.s32.totalorder %v847_v1, 13 }
 0x6a4   :  { %v360_v16 = vmul.f32 %v352_v60, %v349_v15 }
 0x6a6   :  { %361 = vadd.xlane.f32.xlu1 %v360_v16 }
 0x6aa   :  { %v941_v18 = vpop.xlane.xlu2 %85  ;;  %v372_v31 = vpop.xlane.xlu0 %371 }
 0x6ab   :  { %831 = vrcp.f32 %v941_v18  ;;  %v101_v21 = vand.u32 2147483648, %v941_v18  ;;  %vm95_vm7 = vweird.f32 %v941_v18  ;;  %v99_v23 = vand.u32 2147483647, %v941_v18 }
 0x6ac   :  { %v373_v35 = vsel %vm369_vm13, %v372_v31, %v359_v11 }
 0x6ad   :  { %v102_v25 = vor.u32 1.1754944e-38, %v101_v21  ;;  %vm100_vm11 = vcmp.eq.f32.partialorder %v99_v23, 8.507059e+37 }
 0x6b1   :  { %v832_v19 = vpop.eup %831 }
 0x6b2   :  { %v91_v20 = vmul.f32 %v832_v19, %v941_v18  ;;  %vm96_vm8 = vweird.f32 %v832_v19 }
 0x6b3   :  { %vm97_vm10 = vmor %vm95_vm7, %vm96_vm8  ;;  %vm53_vm8 = vcmp.eq.s32.totalorder %v849_v2, %v847_v1 }
 0x6b4   :  { %v92_v22 = vsub.f32 1.0, %v91_v20 }
 0x6b6   :  { %v93_v24 = vmul.f32 %v832_v19, %v92_v22 }
 0x6b8   :  { %v94_v26 = vadd.f32 %v832_v19, %v93_v24 }
 0x6ba   :  { %v98_v28 = vsel %vm97_vm10, %v832_v19, %v94_v26  ;;  %vm58_vm10 = vcmp.le.s32.totalorder %v849_v2, %v847_v1 }
 0x6bb   :  { %v953_v29 = vsel %vm100_vm11, %v102_v25, %v98_v28 }
 0x6bc   :  { %v104_v30 = vmul.f32 %v953_v29, %v89_v27 }
 0x6be   :  { %105 = vst [vmem:[#allocation2 + $0x8] sm:$0xff] %v104_v30 }
 0x6c5   :  { %v379_v32 = vld [vmem:[#allocation2 + $0xf] ss:$0 sm:$0xff]  ;;  %v397_v41 = vld [vmem:[#allocation2 + $0xe] ss:$0 sm:$0xff]  ;;  %v415_v53 = vld [vmem:[#allocation2 + $0xd] ss:$0 sm:$0xff] }
 0x6c6   :  { %v380_v34 = vxor.u32 2147483648, %v379_v32  ;;  %v398_v42 = vxor.u32 2147483648, %v397_v41  ;;  %v416_v57 = vxor.u32 2147483648, %v415_v53  ;;  %v433_v3 = vld [vmem:[#allocation2 + $0xc] ss:$0 sm:$0xff] }
 0x6c7   :  { %v434_v8 = vxor.u32 2147483648, %v433_v3  ;;  %v451_v16 = vld [vmem:[#allocation2 + $0xb] ss:$0 sm:$0xff]  ;;  %v469_v30 = vld [vmem:[#allocation2 + $0xa] ss:$0 sm:$0xff] }
 0x6c8   :  { %v388_v36 = vmul.f32 %v380_v34, %v373_v35  ;;  %v384_v37 = vmul.f32 %v380_v34, %v177_v33  ;;  %v452_v21 = vxor.u32 2147483648, %v451_v16  ;;  %v487_v41 = vld [vmem:[#allocation2 + $0x9] ss:$0 sm:$0xff] }
 0x6ca   :  { %389 = vadd.xlane.f32.xlu0 %v388_v36  ;;  %385 = vadd.xlane.f32.xlu2 %v384_v37 }
 0x719   :  { %v362_v38 = vpop.xlane.xlu1 %361 }
 0x71a   :  { %v363_v39 = vsel %vm355_vm3, %v362_v38, %v349_v15  ;;  %vm437_vm3 = vcmp.eq.s32.totalorder %v847_v1, 12 }
 0x71b   :  { %v374_v40 = vmul.f32 %v366_v10, %v363_v39 }
 0x71d   :  { %375 = vadd.xlane.f32.xlu1 %v374_v40 }
 0x73d   :  { %v390_v44 = vpop.xlane.xlu0 %389  ;;  %v386_v45 = vpop.xlane.xlu2 %385 }
 0x73e   :  { %v391_v46 = vsel %vm383_vm14, %v390_v44, %v373_v35  ;;  %v387_v47 = vsel %vm383_vm14, %v386_v45, %v177_v33  ;;  %v470_v33 = vxor.u32 2147483648, %v469_v30  ;;  %v488_v45 = vxor.u32 2147483648, %v487_v41 }
 0x73f   :  { %v406_v48 = vmul.f32 %v398_v42, %v391_v46  ;;  %v402_v49 = vmul.f32 %v398_v42, %v387_v47 }
 0x741   :  { %407 = vadd.xlane.f32.xlu0 %v406_v48  ;;  %403 = vadd.xlane.f32.xlu2 %v402_v49 }
 0x790   :  { %v376_v50 = vpop.xlane.xlu1 %375 }
 0x791   :  { %v377_v51 = vsel %vm369_vm13, %v376_v50, %v363_v39  ;;  %v36_v50 = vld [vmem:[%s1141_s0] sm:$0xff]  ;;  %vm59_vm13 = vmand %vm58_vm10, %vm49_vm1  ;;  %vm509_vm1 = vcmp.eq.s32.totalorder %v847_v1, 8  ;;  %vm637_vm10 = vcmp.eq.s32.totalorder %v847_v1, 2 }
 0x792   :  { %v392_v52 = vmul.f32 %v380_v34, %v377_v51 }
 0x794   :  { %393 = vadd.xlane.f32.xlu1 %v392_v52 }
 0x7b4   :  { %v408_v55 = vpop.xlane.xlu0 %407  ;;  %v404_v56 = vpop.xlane.xlu2 %403 }
 0x7b5   :  { %v409_v58 = vsel %vm401_vm0, %v408_v55, %v391_v46  ;;  %v405_v59 = vsel %vm401_vm0, %v404_v56, %v387_v47  ;;  %v505_v56 = vld [vmem:[#allocation2 + $0x8] ss:$0 sm:$0xff] }
 0x7b6   :  { %v424_v60 = vmul.f32 %v416_v57, %v409_v58  ;;  %v420_v61 = vmul.f32 %v416_v57, %v405_v59 }
 0x7b8   :  { %425 = vadd.xlane.f32.xlu0 %v424_v60  ;;  %421 = vadd.xlane.f32.xlu2 %v420_v61 }
 0x807   :  { %v394_v62 = vpop.xlane.xlu1 %393 }
 0x808   :  { %v395_v63 = vsel %vm383_vm14, %v394_v62, %v377_v51  ;;  %v55_v51 = vsel %vm53_vm8, %v36_v50, 0.0  ;;  %vm593_vm8 = vcmp.eq.s32.totalorder %v847_v1, 4 }
 0x809   :  { %v410_v0 = vmul.f32 %v398_v42, %v395_v63 }
 0x80b   :  { %411 = vadd.xlane.f32.xlu1 %v410_v0 }
 0x82b   :  { %v426_v4 = vpop.xlane.xlu0 %425  ;;  %v422_v5 = vpop.xlane.xlu2 %421 }
 0x82c   :  { %v427_v9 = vsel %vm419_vm2, %v426_v4, %v409_v58  ;;  %v423_v10 = vsel %vm419_vm2, %v422_v5, %v405_v59  ;;  %v506_v58 = vxor.u32 2147483648, %v505_v56 }
 0x82d   :  { %v442_v11 = vmul.f32 %v434_v8, %v427_v9  ;;  %v438_v12 = vmul.f32 %v434_v8, %v423_v10 }
 0x82f   :  { %443 = vadd.xlane.f32.xlu0 %v442_v11  ;;  %439 = vadd.xlane.f32.xlu2 %v438_v12 }
 0x87e   :  { %v412_v13 = vpop.xlane.xlu1 %411 }
 0x87f   :  { %v413_v14 = vsel %vm401_vm0, %v412_v13, %v395_v63 }
 0x880   :  { %v428_v15 = vmul.f32 %v416_v57, %v413_v14 }
 0x882   :  { %429 = vadd.xlane.f32.xlu1 %v428_v15 }
 0x8a2   :  { %v444_v19 = vpop.xlane.xlu0 %443  ;;  %v440_v20 = vpop.xlane.xlu2 %439 }
 0x8a3   :  { %v445_v22 = vsel %vm437_vm3, %v444_v19, %v427_v9  ;;  %v441_v23 = vsel %vm437_vm3, %v440_v20, %v423_v10  ;;  %v60_v10 = vsel %vm59_vm13, %v36_v50, 0.0  ;;  %vm680_vm13 = vcmp.eq.s32.totalorder %v847_v1, 0 }
 0x8a4   :  { %v460_v24 = vmul.f32 %v452_v21, %v445_v22  ;;  %v456_v25 = vmul.f32 %v452_v21, %v441_v23 }
 0x8a6   :  { %461 = vadd.xlane.f32.xlu0 %v460_v24  ;;  %457 = vadd.xlane.f32.xlu2 %v456_v25 }
 0x8f5   :  { %v430_v26 = vpop.xlane.xlu1 %429 }
 0x8f6   :  { %v431_v27 = vsel %vm419_vm2, %v430_v26, %v413_v14  ;;  %vm169_vm2 = vcmp.eq.s32.totalorder %v847_v1, %v849_v2 }
 0x8f7   :  { %v446_v28 = vmul.f32 %v434_v8, %v431_v27  ;;  %v170_v14 = vsel %vm169_vm2, -1.0, %v836_v7 }
 0x8f9   :  { %447 = vadd.xlane.f32.xlu1 %v446_v28 }
 0x919   :  { %v462_v31 = vpop.xlane.xlu0 %461  ;;  %v458_v32 = vpop.xlane.xlu2 %457 }
 0x91a   :  { %v463_v34 = vsel %vm455_vm4, %v462_v31, %v445_v22  ;;  %v459_v35 = vsel %vm455_vm4, %v458_v32, %v441_v23 }
 0x91b   :  { %v478_v36 = vmul.f32 %v470_v33, %v463_v34  ;;  %v474_v37 = vmul.f32 %v470_v33, %v459_v35 }
 0x91d   :  { %479 = vadd.xlane.f32.xlu0 %v478_v36  ;;  %475 = vadd.xlane.f32.xlu2 %v474_v37 }
 0x96c   :  { %v448_v38 = vpop.xlane.xlu1 %447 }
 0x96d   :  { %v449_v39 = vsel %vm437_vm3, %v448_v38, %v431_v27  ;;  %vm527_vm3 = vcmp.eq.s32.totalorder %v847_v1, 7 }
 0x96e   :  { %v464_v40 = vmul.f32 %v452_v21, %v449_v39 }
 0x970   :  { %465 = vadd.xlane.f32.xlu1 %v464_v40 }
 0x990   :  { %v480_v42 = vpop.xlane.xlu0 %479  ;;  %v476_v44 = vpop.xlane.xlu2 %475 }
 0x991   :  { %v481_v46 = vsel %vm473_vm6, %v480_v42, %v463_v34  ;;  %v477_v47 = vsel %vm473_vm6, %v476_v44, %v459_v35 }
 0x992   :  { %v496_v48 = vmul.f32 %v488_v45, %v481_v46  ;;  %v492_v49 = vmul.f32 %v488_v45, %v477_v47 }
 0x994   :  { %497 = vadd.xlane.f32.xlu0 %v496_v48  ;;  %493 = vadd.xlane.f32.xlu2 %v492_v49 }
 0x99c   :  { %56 = vadd.xlane.f32.xlu2 %v55_v51 }
 0x9e3   :  { %v466_v52 = vpop.xlane.xlu1 %465 }
 0x9e4   :  { %v467_v53 = vsel %vm455_vm4, %v466_v52, %v449_v39  ;;  %vm549_vm4 = vcmp.eq.s32.totalorder %v847_v1, 6 }
 0x9e5   :  { %v482_v55 = vmul.f32 %v470_v33, %v467_v53 }
 0x9e7   :  { %483 = vadd.xlane.f32.xlu1 %v482_v55 }
 0xa07   :  { %v494_v57 = vpop.xlane.xlu2 %493  ;;  %v498_v23 = vpop.xlane.xlu0 %497 }
 0xa08   :  { %v495_v59 = vsel %vm491_vm9, %v494_v57, %v477_v47  ;;  %v499_v24 = vsel %vm491_vm9, %v498_v23, %v481_v46 }
 0xa09   :  { %v510_v60 = vmul.f32 %v506_v58, %v495_v59  ;;  %v514_v25 = vmul.f32 %v506_v58, %v499_v24 }
 0xa0b   :  { %511 = vadd.xlane.f32.xlu0 %v510_v60 }
 0xa0f   :  { %v1013_v61 = vpop.xlane.xlu2 %56 }
 0xa10   :  { %833 = vrcp.f32 %v1013_v61  ;;  %v72_v0 = vand.u32 2147483648, %v1013_v61  ;;  %vm66_vm11 = vweird.f32 %v1013_v61  ;;  %v70_v4 = vand.u32 2147483647, %v1013_v61 }
 0xa12   :  { %v73_v8 = vor.u32 1.1754944e-38, %v72_v0  ;;  %vm71_vm0 = vcmp.eq.f32.partialorder %v70_v4, 8.507059e+37 }
 0xa16   :  { %v834_v62 = vpop.eup %833 }
 0xa17   :  { %v62_v63 = vmul.f32 %v834_v62, %v1013_v61  ;;  %vm67_vm12 = vweird.f32 %v834_v62 }
 0xa18   :  { %vm68_vm14 = vmor %vm66_vm11, %vm67_vm12  ;;  %vm659_vm12 = vcmp.eq.s32.totalorder %v847_v1, 1 }
 0xa19   :  { %v63_v3 = vsub.f32 1.0, %v62_v63 }
 0xa1b   :  { %v64_v5 = vmul.f32 %v834_v62, %v63_v3 }
 0xa1d   :  { %v65_v9 = vadd.f32 %v834_v62, %v64_v5 }
 0xa1f   :  { %v69_v11 = vsel %vm68_vm14, %v834_v62, %v65_v9 }
 0xa20   :  { %v1026_v12 = vsel %vm71_vm0, %v73_v8, %v69_v11 }
 0xa21   :  { %v75_v13 = vmul.f32 %v1026_v12, %v60_v10 }
 0xa23   :  { %76 = vst [vmem:[#allocation2] sm:$0xff] %v75_v13 }
 0xa2a   :  { %v523_v15 = vld [vmem:[#allocation2 + $0x7] ss:$0 sm:$0xff]  ;;  %v545_v27 = vld [vmem:[#allocation2 + $0x6] ss:$0 sm:$0xff]  ;;  %v567_v42 = vld [vmem:[#allocation2 + $0x5] ss:$0 sm:$0xff] }
 0xa2b   :  { %v524_v16 = vxor.u32 2147483648, %v523_v15  ;;  %v546_v28 = vxor.u32 2147483648, %v545_v27  ;;  %v568_v44 = vxor.u32 2147483648, %v567_v42 }
 0xa2d   :  { %v528_v19 = vmul.f32 %v524_v16, %v170_v14 }
 0xa2f   :  { %529 = vadd.xlane.f32.xlu0 %v528_v19 }
 0xa5a   :  { %v484_v20 = vpop.xlane.xlu1 %483 }
 0xa5b   :  { %v485_v21 = vsel %vm473_vm6, %v484_v20, %v467_v53  ;;  %vm571_vm6 = vcmp.eq.s32.totalorder %v847_v1, 5 }
 0xa5c   :  { %v500_v22 = vmul.f32 %v488_v45, %v485_v21 }
 0xa5e   :  { %501 = vadd.xlane.f32.xlu1 %v500_v22 }
 0xa66   :  { %515 = vadd.xlane.f32.xlu1 %v514_v25 }
 0xa7e   :  { %v512_v2 = vpop.xlane.xlu0 %511 }
 0xa7f   :  { %v513_v7 = vsel %vm509_vm1, %v512_v2, %v495_v59 }
 0xa80   :  { %v532_v26 = vmul.f32 %v524_v16, %v513_v7 }
 0xa82   :  { %533 = vadd.xlane.f32.xlu1 %v532_v26 }
 0xaa2   :  { %v530_v30 = vpop.xlane.xlu0 %529 }
 0xaa3   :  { %v531_v31 = vsel %vm527_vm3, %v530_v30, %v170_v14  ;;  %v611_v14 = vld [vmem:[#allocation2 + $0x3] ss:$0 sm:$0xff] }
 0xaa4   :  { %v550_v32 = vmul.f32 %v546_v28, %v531_v31 }
 0xaa6   :  { %551 = vadd.xlane.f32.xlu1 %v550_v32 }
 0xad1   :  { %v502_v33 = vpop.xlane.xlu1 %501 }
 0xad2   :  { %v503_v34 = vsel %vm491_vm9, %v502_v33, %v485_v21  ;;  %vm615_vm9 = vcmp.eq.s32.totalorder %v847_v1, 3 }
 0xad3   :  { %v518_v35 = vmul.f32 %v506_v58, %v503_v34  ;;  %v589_v58 = vld [vmem:[#allocation2 + $0x4] ss:$0 sm:$0xff] }
 0xad4   :  { %v590_v60 = vxor.u32 2147483648, %v589_v58 }
 0xad5   :  { %519 = vadd.xlane.f32.xlu2 %v518_v35 }
 0xad9   :  { %v516_v36 = vpop.xlane.xlu1 %515 }
 0xada   :  { %v517_v37 = vsel %vm509_vm1, %v516_v36, %v499_v24 }
 0xadb   :  { %v536_v38 = vmul.f32 %v524_v16, %v517_v37 }
 0xadd   :  { %537 = vadd.xlane.f32.xlu2 %v536_v38 }
 0xaf5   :  { %v534_v39 = vpop.xlane.xlu1 %533 }
 0xaf6   :  { %v535_v40 = vsel %vm527_vm3, %v534_v39, %v513_v7 }
 0xaf7   :  { %v554_v41 = vmul.f32 %v546_v28, %v535_v40 }
 0xaf9   :  { %555 = vadd.xlane.f32.xlu2 %v554_v41 }
 0xb19   :  { %v552_v45 = vpop.xlane.xlu1 %551 }
 0xb1a   :  { %v553_v46 = vsel %vm549_vm4, %v552_v45, %v531_v31 }
 0xb1b   :  { %v572_v47 = vmul.f32 %v568_v44, %v553_v46 }
 0xb1d   :  { %573 = vadd.xlane.f32.xlu2 %v572_v47 }
 0xb48   :  { %v520_v48 = vpop.xlane.xlu2 %519 }
 0xb49   :  { %v521_v49 = vsel %vm509_vm1, %v520_v48, %v503_v34 }
 0xb4a   :  { %v540_v50 = vmul.f32 %v524_v16, %v521_v49  ;;  %v612_v16 = vxor.u32 2147483648, %v611_v14 }
 0xb4c   :  { %541 = vadd.xlane.f32.xlu0 %v540_v50 }
 0xb50   :  { %v538_v51 = vpop.xlane.xlu2 %537 }
 0xb51   :  { %v539_v52 = vsel %vm527_vm3, %v538_v51, %v517_v37 }
 0xb52   :  { %v558_v53 = vmul.f32 %v546_v28, %v539_v52 }
 0xb54   :  { %559 = vadd.xlane.f32.xlu0 %v558_v53 }
 0xb6c   :  { %v556_v55 = vpop.xlane.xlu2 %555 }
 0xb6d   :  { %v557_v56 = vsel %vm549_vm4, %v556_v55, %v535_v40 }
 0xb6e   :  { %v576_v57 = vmul.f32 %v568_v44, %v557_v56 }
 0xb70   :  { %577 = vadd.xlane.f32.xlu0 %v576_v57 }
 0xb90   :  { %v574_v59 = vpop.xlane.xlu2 %573 }
 0xb91   :  { %v575_v62 = vsel %vm571_vm6, %v574_v59, %v553_v46  ;;  %v676_v59 = vld [vmem:[#allocation2] ss:$0 sm:$0xff] }
 0xb92   :  { %v594_v63 = vmul.f32 %v590_v60, %v575_v62 }
 0xb94   :  { %595 = vadd.xlane.f32.xlu0 %v594_v63 }
 0xbbf   :  { %v542_v0 = vpop.xlane.xlu0 %541 }
 0xbc0   :  { %v543_v3 = vsel %vm527_vm3, %v542_v0, %v521_v49 }
 0xbc1   :  { %v562_v4 = vmul.f32 %v546_v28, %v543_v3  ;;  %v633_v28 = vld [vmem:[#allocation2 + $0x2] ss:$0 sm:$0xff] }
 0xbc2   :  { %v634_v31 = vxor.u32 2147483648, %v633_v28 }
 0xbc3   :  { %563 = vadd.xlane.f32.xlu1 %v562_v4 }
 0xbc7   :  { %v560_v5 = vpop.xlane.xlu0 %559 }
 0xbc8   :  { %v561_v8 = vsel %vm549_vm4, %v560_v5, %v539_v52 }
 0xbc9   :  { %v580_v9 = vmul.f32 %v568_v44, %v561_v8 }
 0xbcb   :  { %581 = vadd.xlane.f32.xlu1 %v580_v9 }
 0xbe3   :  { %v578_v10 = vpop.xlane.xlu0 %577 }
 0xbe4   :  { %v579_v11 = vsel %vm571_vm6, %v578_v10, %v557_v56 }
 0xbe5   :  { %v598_v13 = vmul.f32 %v590_v60, %v579_v11 }
 0xbe7   :  { %599 = vadd.xlane.f32.xlu1 %v598_v13 }
 0xc07   :  { %v596_v15 = vpop.xlane.xlu0 %595 }
 0xc08   :  { %v597_v19 = vsel %vm593_vm8, %v596_v15, %v575_v62  ;;  %v677_v62 = vxor.u32 2147483648, %v676_v59 }
 0xc09   :  { %v616_v20 = vmul.f32 %v612_v16, %v597_v19 }
 0xc0b   :  { %617 = vadd.xlane.f32.xlu1 %v616_v20 }
 0xc36   :  { %v564_v21 = vpop.xlane.xlu1 %563 }
 0xc37   :  { %v565_v22 = vsel %vm549_vm4, %v564_v21, %v543_v3 }
 0xc38   :  { %v584_v23 = vmul.f32 %v568_v44, %v565_v22  ;;  %v655_v44 = vld [vmem:[#allocation2 + $0x1] ss:$0 sm:$0xff] }
 0xc39   :  { %v656_v46 = vxor.u32 2147483648, %v655_v44 }
 0xc3a   :  { %585 = vadd.xlane.f32.xlu2 %v584_v23 }
 0xc3e   :  { %v582_v24 = vpop.xlane.xlu1 %581 }
 0xc3f   :  { %v583_v25 = vsel %vm571_vm6, %v582_v24, %v561_v8 }
 0xc40   :  { %v602_v2 = vmul.f32 %v590_v60, %v583_v25 }
 0xc42   :  { %603 = vadd.xlane.f32.xlu2 %v602_v2 }
 0xc5a   :  { %v600_v7 = vpop.xlane.xlu1 %599 }
 0xc5b   :  { %v601_v26 = vsel %vm593_vm8, %v600_v7, %v579_v11 }
 0xc5c   :  { %v620_v27 = vmul.f32 %v612_v16, %v601_v26 }
 0xc5e   :  { %621 = vadd.xlane.f32.xlu2 %v620_v27 }
 0xc7e   :  { %v618_v30 = vpop.xlane.xlu1 %617 }
 0xc7f   :  { %v619_v32 = vsel %vm615_vm9, %v618_v30, %v597_v19 }
 0xc80   :  { %v638_v33 = vmul.f32 %v634_v31, %v619_v32 }
 0xc82   :  { %639 = vadd.xlane.f32.xlu2 %v638_v33 }
 0xcad   :  { %v586_v34 = vpop.xlane.xlu2 %585 }
 0xcae   :  { %v587_v35 = vsel %vm571_vm6, %v586_v34, %v565_v22 }
 0xcaf   :  { %v606_v36 = vmul.f32 %v590_v60, %v587_v35 }
 0xcb1   :  { %607 = vadd.xlane.f32.xlu0 %v606_v36 }
 0xcb5   :  { %v604_v37 = vpop.xlane.xlu2 %603 }
 0xcb6   :  { %v605_v38 = vsel %vm593_vm8, %v604_v37, %v583_v25 }
 0xcb7   :  { %v624_v39 = vmul.f32 %v612_v16, %v605_v38 }
 0xcb9   :  { %625 = vadd.xlane.f32.xlu0 %v624_v39 }
 0xcd1   :  { %v622_v40 = vpop.xlane.xlu2 %621 }
 0xcd2   :  { %v623_v41 = vsel %vm615_vm9, %v622_v40, %v601_v26 }
 0xcd3   :  { %v642_v42 = vmul.f32 %v634_v31, %v623_v41 }
 0xcd5   :  { %643 = vadd.xlane.f32.xlu0 %v642_v42 }
 0xcf5   :  { %v640_v45 = vpop.xlane.xlu2 %639 }
 0xcf6   :  { %v641_v47 = vsel %vm637_vm10, %v640_v45, %v619_v32 }
 0xcf7   :  { %v660_v48 = vmul.f32 %v656_v46, %v641_v47 }
 0xcf9   :  { %661 = vadd.xlane.f32.xlu0 %v660_v48 }
 0xd24   :  { %v608_v49 = vpop.xlane.xlu0 %607 }
 0xd25   :  { %v609_v50 = vsel %vm593_vm8, %v608_v49, %v587_v35 }
 0xd26   :  { %v628_v51 = vmul.f32 %v612_v16, %v609_v50 }
 0xd28   :  { %629 = vadd.xlane.f32.xlu1 %v628_v51 }
 0xd2c   :  { %v626_v52 = vpop.xlane.xlu0 %625 }
 0xd2d   :  { %v627_v53 = vsel %vm615_vm9, %v626_v52, %v605_v38 }
 0xd2e   :  { %v646_v55 = vmul.f32 %v634_v31, %v627_v53 }
 0xd30   :  { %647 = vadd.xlane.f32.xlu1 %v646_v55 }
 0xd48   :  { %v644_v56 = vpop.xlane.xlu0 %643 }
 0xd49   :  { %v645_v57 = vsel %vm637_vm10, %v644_v56, %v623_v41 }
 0xd4a   :  { %v664_v58 = vmul.f32 %v656_v46, %v645_v57 }
 0xd4c   :  { %665 = vadd.xlane.f32.xlu1 %v664_v58 }
 0xd6c   :  { %v662_v60 = vpop.xlane.xlu0 %661 }
 0xd6d   :  { %v663_v63 = vsel %vm659_vm12, %v662_v60, %v641_v47 }
 0xd6e   :  { %v681_v0 = vmul.f32 %v677_v62, %v663_v63 }
 0xd70   :  { %682 = vadd.xlane.f32.xlu1 %v681_v0 }
 0xd9b   :  { %v630_v3 = vpop.xlane.xlu1 %629 }
 0xd9c   :  { %v631_v4 = vsel %vm615_vm9, %v630_v3, %v609_v50 }
 0xd9d   :  { %v650_v5 = vmul.f32 %v634_v31, %v631_v4 }
 0xd9f   :  { %651 = vadd.xlane.f32.xlu2 %v650_v5 }
 0xda3   :  { %v648_v8 = vpop.xlane.xlu1 %647 }
 0xda4   :  { %v649_v9 = vsel %vm637_vm10, %v648_v8, %v627_v53 }
 0xda5   :  { %v668_v10 = vmul.f32 %v656_v46, %v649_v9 }
 0xda7   :  { %669 = vadd.xlane.f32.xlu2 %v668_v10 }
 0xdbf   :  { %v666_v11 = vpop.xlane.xlu1 %665 }
 0xdc0   :  { %v667_v13 = vsel %vm659_vm12, %v666_v11, %v645_v57 }
 0xdc1   :  { %v685_v14 = vmul.f32 %v677_v62, %v667_v13 }
 0xdc3   :  { %686 = vadd.xlane.f32.xlu2 %v685_v14 }
 0xde3   :  { %v683_v15 = vpop.xlane.xlu1 %682 }
 0xde4   :  { %v684_v16 = vsel %vm680_vm13, %v683_v15, %v663_v63 }
 0xde5   :  { %v711_v19 = vmul.f32 %v684_v16, %v1026_v12 }
 0xde7   :  { %v713_v20 = vsel %vm66_vm11, %v684_v16, %v711_v19 }
 0xde8   :  { %807 = vst [vmem:[%s1142_s1] sm:$0xff] %v713_v20 }
 0xe12   :  { %v652_v21 = vpop.xlane.xlu2 %651 }
 0xe13   :  { %v653_v22 = vsel %vm637_vm10, %v652_v21, %v631_v4 }
 0xe14   :  { %v672_v23 = vmul.f32 %v656_v46, %v653_v22 }
 0xe16   :  { %673 = vadd.xlane.f32.xlu0 %v672_v23 }
 0xe1a   :  { %v670_v24 = vpop.xlane.xlu2 %669 }
 0xe1b   :  { %v671_v25 = vsel %vm659_vm12, %v670_v24, %v649_v9 }
 0xe1c   :  { %v689_v2 = vmul.f32 %v677_v62, %v671_v25 }
 0xe1e   :  { %690 = vadd.xlane.f32.xlu0 %v689_v2 }
 0xe36   :  { %v687_v12 = vpop.xlane.xlu2 %686 }
 0xe37   :  { %v688_v61 = vsel %vm680_vm13, %v687_v12, %v667_v13 }
 0xe38   :  { %v729_v7 = vmul.f32 %v688_v61, %v953_v29 }
 0xe3a   :  { %v731_v26 = vsel %vm95_vm7, %v688_v61, %v729_v7 }
 0xe3b   :  { %809 = vst [vmem:[%s1142_s1 + $0x8] sm:$0xff] %v731_v26 }
 0xe89   :  { %v674_v27 = vpop.xlane.xlu0 %673 }
 0xe8a   :  { %v675_v28 = vsel %vm659_vm12, %v674_v27, %v653_v22 }
 0xe8b   :  { %v693_v30 = vmul.f32 %v677_v62, %v675_v28 }
 0xe8d   :  { %694 = vadd.xlane.f32.xlu1 %v693_v30 }
 0xe91   :  { %v691_v31 = vpop.xlane.xlu0 %690 }
 0xe92   :  { %v692_v32 = vsel %vm680_vm13, %v691_v31, %v671_v25 }
 0xe93   :  { %v748_v33 = vmul.f32 %v692_v32, %v894_v54 }
 0xe95   :  { %v750_v18 = vsel %vm124_vm15, %v692_v32, %v748_v33 }
 0xe96   :  { %811 = vst [vmem:[%s1142_s1 + $0x10] sm:$0xff] %v750_v18 }
 0xf00   :  { %v695_v29 = vpop.xlane.xlu1 %694 }
 0xf01   :  { %v696_v34 = vsel %vm680_vm13, %v695_v29, %v675_v28 }
 0xf02   :  { %v767_v35 = vmul.f32 %v696_v34, %v869_v17 }
 0xf04   :  { %v769_v36 = vsel %vm153_vm5, %v696_v34, %v767_v35 }
 0xf05   :  { %813 = vst [vmem:[%s1142_s1 + $0x18] sm:$0xff] %v769_v36 }

// kernel: custom-call.13
= control target key start
LH: loop header
LB: loop body
LE: loop exit
PB: predicated region body
PF: predicated region fallthrough
CT: control target
= control target key end

     0   :  { %v47_v0 = vlaneseq  ;;  %v836_v18 = vmov -1.0   ;;  %v837_v61 = vmov 0.0   ;;  %s1040_s0 = inlined_call_operand.vmem [shape: f32[1,32,32], index: 0, kind: input, shape index: {}]   ;;  %s1041_s1 = inlined_call_operand.vmem [shape: f32[1,32,32], index: 1, kind: output, shape index: {}]  }
   0x1   :  { %v36_v1 = vld [vmem:[%s1040_s0] sm:$0xff]  ;;  %v38_v39 = vld [vmem:[%s1040_s0 + $0x8] sm:$0xff] }
   0x2   :  { %v851_v2 = vand.u32 127, %v47_v0  ;;  %v853_v3 = vshrl.u32 %v47_v0, 7 }
   0x4   :  { %vm53_vm0 = vcmp.eq.s32.totalorder %v853_v3, %v851_v2  ;;  %vm49_vm1 = vcmp.lt.s32.totalorder %v851_v2, 32  ;;  %vm58_vm2 = vcmp.ge.s32.totalorder %v853_v3, %v851_v2  ;;  %vm172_vm8 = vcmp.eq.s32.totalorder %v851_v2, 0 }
   0x5   :  { %v55_v4 = vsel %vm53_vm0, %v36_v1, 0.0  ;;  %vm59_vm3 = vmand %vm58_vm2, %vm49_vm1  ;;  %vm169_vm9 = vcmp.eq.s32.totalorder %v851_v2, %v853_v3  ;;  %v173_v19 = vsel %vm172_vm8, 1.0, %v836_v18  ;;  %vm201_vm10 = vcmp.eq.s32.totalorder %v851_v2, 1 }
   0x6   :  { %56 = vadd.xlane.f32.xlu0 %v55_v4  ;;  %v60_v13 = vsel %vm59_vm3, %v36_v1, 0.0  ;;  %v174_v20 = vsel %vm169_vm9, %v173_v19, 0.0  ;;  %vm211_vm11 = vcmp.eq.s32.totalorder %v851_v2, 2  ;;  %vm221_vm12 = vcmp.eq.s32.totalorder %v851_v2, 3 }
   0x7   :  { %v81_v40 = vadd.s32 8, %v853_v3  ;;  %vm231_vm14 = vcmp.eq.s32.totalorder %v851_v2, 4  ;;  %vm241_vm8 = vcmp.eq.s32.totalorder %v851_v2, 5  ;;  %vm251_vm9 = vcmp.eq.s32.totalorder %v851_v2, 6 }
   0x9   :  { %vm82_vm13 = vcmp.eq.s32.totalorder %v81_v40, %v851_v2  ;;  %vm87_vm15 = vcmp.ge.s32.totalorder %v81_v40, %v851_v2 }
   0xa   :  { %v84_v41 = vsel %vm82_vm13, %v38_v39, 0.0  ;;  %vm88_vm3 = vmand %vm87_vm15, %vm49_vm1  ;;  %vm299_vm13 = vcmp.eq.s32.totalorder %v851_v2, 10  ;;  %vm327_vm15 = vcmp.eq.s32.totalorder %v851_v2, 12 }
   0xb   :  { %v89_v56 = vsel %vm88_vm3, %v38_v39, 0.0  ;;  %vm341_vm3 = vcmp.eq.s32.totalorder %v851_v2, 13 }
  0x79   :  { %v857_v5 = vpop.xlane.xlu0 %56 }
  0x7a   :  { %828 = vrcp.f32 %v857_v5  ;;  %v72_v9 = vand.u32 2147483648, %v857_v5  ;;  %v70_v11 = vand.u32 2147483647, %v857_v5  ;;  %vm66_vm5 = vweird.f32 %v857_v5 }
  0x7c   :  { %v73_v14 = vor.u32 1.1754944e-38, %v72_v9  ;;  %vm71_vm7 = vcmp.eq.f32.partialorder %v70_v11, 8.507059e+37 }
  0x80   :  { %v829_v6 = vpop.eup %828 }
  0x81   :  { %v62_v7 = vmul.f32 %v829_v6, %v857_v5  ;;  %vm67_vm4 = vweird.f32 %v829_v6 }
  0x82   :  { %vm68_vm6 = vmor %vm66_vm5, %vm67_vm4 }
  0x83   :  { %v63_v8 = vsub.f32 1.0, %v62_v7 }
  0x85   :  { %v64_v10 = vmul.f32 %v829_v6, %v63_v8 }
  0x87   :  { %v65_v12 = vadd.f32 %v829_v6, %v64_v10 }
  0x89   :  { %v69_v15 = vsel %vm68_vm6, %v829_v6, %v65_v12 }
  0x8a   :  { %v871_v16 = vsel %vm71_vm7, %v73_v14, %v69_v15  ;;  %vm180_vm7 = vcmp.eq.s32.totalorder %v851_v2, %v81_v40 }
  0x8b   :  { %v75_v17 = vmul.f32 %v871_v16, %v60_v13  ;;  %v181_v62 = vsel %vm180_vm7, -1.0, %v837_v61 }
  0x8d   :  { %76 = vst [vmem:[#allocation2] sm:$0xff] %v75_v17 }
  0x94   :  { %v197_v21 = vld [vmem:[#allocation2 + $0x1] ss:$0 sm:$0xff]  ;;  %v207_v24 = vld [vmem:[#allocation2 + $0x2] ss:$0 sm:$0xff]  ;;  %v217_v29 = vld [vmem:[#allocation2 + $0x3] ss:$0 sm:$0xff] }
  0x95   :  { %v198_v22 = vxor.u32 2147483648, %v197_v21  ;;  %v208_v26 = vxor.u32 2147483648, %v207_v24  ;;  %v218_v31 = vxor.u32 2147483648, %v217_v29  ;;  %v227_v34 = vld [vmem:[#allocation2 + $0x4] ss:$0 sm:$0xff] }
  0x96   :  { %v228_v36 = vxor.u32 2147483648, %v227_v34  ;;  %v237_v42 = vld [vmem:[#allocation2 + $0x5] ss:$0 sm:$0xff]  ;;  %v247_v60 = vld [vmem:[#allocation2 + $0x6] ss:$0 sm:$0xff] }
  0x97   :  { %v202_v23 = vmul.f32 %v198_v22, %v174_v20  ;;  %v238_v44 = vxor.u32 2147483648, %v237_v42  ;;  %v248_v1 = vxor.u32 2147483648, %v247_v60  ;;  %v257_v9 = vld [vmem:[#allocation2 + $0x7] ss:$0 sm:$0xff] }
  0x98   :  { %v258_v11 = vxor.u32 2147483648, %v257_v9 }
  0x99   :  { %203 = vadd.xlane.f32.xlu0 %v202_v23 }
 0x10c   :  { %v204_v25 = vpop.xlane.xlu0 %203 }
 0x10d   :  { %v205_v27 = vsel %vm201_vm10, %v204_v25, %v174_v20  ;;  %vm261_vm10 = vcmp.eq.s32.totalorder %v851_v2, 7 }
 0x10e   :  { %v212_v28 = vmul.f32 %v208_v26, %v205_v27 }
 0x110   :  { %213 = vadd.xlane.f32.xlu1 %v212_v28 }
 0x183   :  { %v214_v30 = vpop.xlane.xlu1 %213 }
 0x184   :  { %v215_v32 = vsel %vm211_vm11, %v214_v30, %v205_v27  ;;  %vm271_vm11 = vcmp.eq.s32.totalorder %v851_v2, 8 }
 0x185   :  { %v222_v33 = vmul.f32 %v218_v31, %v215_v32 }
 0x187   :  { %223 = vadd.xlane.f32.xlu1 %v222_v33 }
 0x18f   :  { %85 = vadd.xlane.f32.xlu1 %v84_v41 }
 0x1fa   :  { %v224_v35 = vpop.xlane.xlu1 %223 }
 0x1fb   :  { %v225_v37 = vsel %vm221_vm12, %v224_v35, %v215_v32  ;;  %vm285_vm12 = vcmp.eq.s32.totalorder %v851_v2, 9 }
 0x1fc   :  { %v232_v38 = vmul.f32 %v228_v36, %v225_v37 }
 0x1fe   :  { %233 = vadd.xlane.f32.xlu2 %v232_v38 }
 0x202   :  { %v886_v47 = vpop.xlane.xlu1 %85 }
 0x203   :  { %830 = vrcp.f32 %v886_v47  ;;  %v101_v50 = vand.u32 2147483648, %v886_v47  ;;  %vm95_vm0 = vweird.f32 %v886_v47  ;;  %v99_v52 = vand.u32 2147483647, %v886_v47 }
 0x205   :  { %v102_v54 = vor.u32 1.1754944e-38, %v101_v50  ;;  %vm100_vm6 = vcmp.eq.f32.partialorder %v99_v52, 8.507059e+37 }
 0x209   :  { %v831_v48 = vpop.eup %830 }
 0x20a   :  { %v91_v49 = vmul.f32 %v831_v48, %v886_v47  ;;  %vm96_vm2 = vweird.f32 %v831_v48 }
 0x20b   :  { %vm97_vm4 = vmor %vm95_vm0, %vm96_vm2 }
 0x20c   :  { %v92_v51 = vsub.f32 1.0, %v91_v49 }
 0x20e   :  { %v93_v53 = vmul.f32 %v831_v48, %v92_v51 }
 0x210   :  { %v94_v55 = vadd.f32 %v831_v48, %v93_v53 }
 0x212   :  { %v98_v57 = vsel %vm97_vm4, %v831_v48, %v94_v55 }
 0x213   :  { %v898_v58 = vsel %vm100_vm6, %v102_v54, %v98_v57  ;;  %v40_v57 = vld [vmem:[%s1040_s0 + $0x10] sm:$0xff] }
 0x214   :  { %v104_v59 = vmul.f32 %v898_v58, %v89_v56  ;;  %v110_v56 = vadd.s32 16, %v853_v3 }
 0x216   :  { %105 = vst [vmem:[#allocation2 + $0x8] sm:$0xff] %v104_v59  ;;  %vm111_vm2 = vcmp.eq.s32.totalorder %v110_v56, %v851_v2  ;;  %vm116_vm4 = vcmp.ge.s32.totalorder %v110_v56, %v851_v2 }
 0x217   :  { %v113_v59 = vsel %vm111_vm2, %v40_v57, 0.0  ;;  %vm419_vm2 = vcmp.eq.s32.totalorder %v851_v2, 18 }
 0x21d   :  { %v267_v63 = vld [vmem:[#allocation2 + $0x8] ss:$0 sm:$0xff]  ;;  %v281_v18 = vld [vmem:[#allocation2 + $0x9] ss:$0 sm:$0xff]  ;;  %v295_v26 = vld [vmem:[#allocation2 + $0xa] ss:$0 sm:$0xff] }
 0x21e   :  { %v268_v4 = vxor.u32 2147483648, %v267_v63  ;;  %v282_v20 = vxor.u32 2147483648, %v281_v18  ;;  %v296_v28 = vxor.u32 2147483648, %v295_v26  ;;  %v309_v34 = vld [vmem:[#allocation2 + $0xb] ss:$0 sm:$0xff] }
 0x21f   :  { %v310_v36 = vxor.u32 2147483648, %v309_v34  ;;  %v323_v42 = vld [vmem:[#allocation2 + $0xc] ss:$0 sm:$0xff]  ;;  %v337_v51 = vld [vmem:[#allocation2 + $0xd] ss:$0 sm:$0xff] }
 0x220   :  { %v276_v8 = vmul.f32 %v268_v4, %v181_v62  ;;  %v338_v53 = vxor.u32 2147483648, %v337_v51 }
 0x222   :  { %277 = vadd.xlane.f32.xlu1 %v276_v8 }
 0x271   :  { %v234_v43 = vpop.xlane.xlu2 %233 }
 0x272   :  { %v235_v45 = vsel %vm231_vm14, %v234_v43, %v225_v37  ;;  %vm313_vm14 = vcmp.eq.s32.totalorder %v851_v2, 11 }
 0x273   :  { %v242_v46 = vmul.f32 %v238_v44, %v235_v45  ;;  %v324_v44 = vxor.u32 2147483648, %v323_v42 }
 0x275   :  { %243 = vadd.xlane.f32.xlu2 %v242_v46 }
 0x295   :  { %v278_v19 = vpop.xlane.xlu1 %277 }
 0x296   :  { %v279_v21 = vsel %vm271_vm11, %v278_v19, %v181_v62 }
 0x297   :  { %v290_v22 = vmul.f32 %v282_v20, %v279_v21 }
 0x2e8   :  { %v244_v0 = vpop.xlane.xlu2 %243 }
 0x2e9   :  { %v245_v6 = vsel %vm241_vm8, %v244_v0, %v235_v45  ;;  %v351_v0 = vld [vmem:[#allocation2 + $0xe] ss:$0 sm:$0xff]  ;;  %vm117_vm8 = vmand %vm116_vm4, %vm49_vm1  ;;  %vm455_vm4 = vcmp.eq.s32.totalorder %v851_v2, 20 }
 0x2ea   :  { %v252_v7 = vmul.f32 %v248_v1, %v245_v6  ;;  %v118_v18 = vsel %vm117_vm8, %v40_v57, 0.0 }
 0x2ec   :  { %253 = vadd.xlane.f32.xlu0 %v252_v7 }
 0x35f   :  { %v254_v10 = vpop.xlane.xlu0 %253 }
 0x360   :  { %v255_v12 = vsel %vm251_vm9, %v254_v10, %v245_v6 }
 0x361   :  { %v262_v13 = vmul.f32 %v258_v11, %v255_v12 }
 0x363   :  { %263 = vadd.xlane.f32.xlu2 %v262_v13 }
 0x3d6   :  { %v264_v14 = vpop.xlane.xlu2 %263 }
 0x3d7   :  { %v265_v15 = vsel %vm261_vm10, %v264_v14, %v255_v12 }
 0x3d8   :  { %v272_v17 = vmul.f32 %v268_v4, %v265_v15  ;;  %v352_v4 = vxor.u32 2147483648, %v351_v0 }
 0x3da   :  { %273 = vadd.xlane.f32.xlu0 %v272_v17 }
 0x3e2   :  { %291 = vadd.xlane.f32.xlu0 %v290_v22 }
 0x44d   :  { %v274_v23 = vpop.xlane.xlu0 %273 }
 0x44e   :  { %v275_v24 = vsel %vm271_vm11, %v274_v23, %v265_v15  ;;  %vm355_vm11 = vcmp.eq.s32.totalorder %v851_v2, 14 }
 0x44f   :  { %v286_v25 = vmul.f32 %v282_v20, %v275_v24 }
 0x451   :  { %287 = vadd.xlane.f32.xlu2 %v286_v25  ;;  %v365_v25 = vld [vmem:[#allocation2 + $0xf] ss:$0 sm:$0xff] }
 0x455   :  { %v292_v27 = vpop.xlane.xlu0 %291 }
 0x456   :  { %v293_v29 = vsel %vm285_vm12, %v292_v27, %v279_v21  ;;  %v366_v27 = vxor.u32 2147483648, %v365_v25 }
 0x457   :  { %v304_v30 = vmul.f32 %v296_v28, %v293_v29 }
 0x459   :  { %305 = vadd.xlane.f32.xlu2 %v304_v30 }
 0x4c4   :  { %v288_v31 = vpop.xlane.xlu2 %287 }
 0x4c5   :  { %v289_v32 = vsel %vm285_vm12, %v288_v31, %v275_v24  ;;  %vm187_vm12 = vcmp.eq.s32.totalorder %v851_v2, %v110_v56 }
 0x4c6   :  { %v300_v33 = vmul.f32 %v296_v28, %v289_v32 }
 0x4c8   :  { %301 = vadd.xlane.f32.xlu1 %v300_v33 }
 0x4cc   :  { %v306_v35 = vpop.xlane.xlu2 %305 }
 0x4cd   :  { %v307_v37 = vsel %vm299_vm13, %v306_v35, %v293_v29 }
 0x4ce   :  { %v318_v38 = vmul.f32 %v310_v36, %v307_v37 }
 0x4d0   :  { %319 = vadd.xlane.f32.xlu1 %v318_v38 }
 0x53b   :  { %v302_v39 = vpop.xlane.xlu1 %301 }
 0x53c   :  { %v303_v40 = vsel %vm299_vm13, %v302_v39, %v289_v32  ;;  %v188_v32 = vsel %vm187_vm12, -1.0, %v837_v61  ;;  %vm369_vm13 = vcmp.eq.s32.totalorder %v851_v2, 15 }
 0x53d   :  { %v314_v41 = vmul.f32 %v310_v36, %v303_v40 }
 0x53f   :  { %315 = vadd.xlane.f32.xlu0 %v314_v41 }
 0x543   :  { %v320_v43 = vpop.xlane.xlu1 %319 }
 0x544   :  { %v321_v45 = vsel %vm313_vm14, %v320_v43, %v307_v37 }
 0x545   :  { %v332_v46 = vmul.f32 %v324_v44, %v321_v45 }
 0x547   :  { %333 = vadd.xlane.f32.xlu0 %v332_v46 }
 0x5b2   :  { %v316_v48 = vpop.xlane.xlu0 %315 }
 0x5b3   :  { %v317_v49 = vsel %vm313_vm14, %v316_v48, %v303_v40  ;;  %vm383_vm14 = vcmp.eq.s32.totalorder %v851_v2, 16 }
 0x5b4   :  { %v328_v50 = vmul.f32 %v324_v44, %v317_v49 }
 0x5b6   :  { %329 = vadd.xlane.f32.xlu2 %v328_v50 }
 0x5ba   :  { %v334_v52 = vpop.xlane.xlu0 %333 }
 0x5bb   :  { %v335_v54 = vsel %vm327_vm15, %v334_v52, %v321_v45 }
 0x5bc   :  { %v346_v55 = vmul.f32 %v338_v53, %v335_v54 }
 0x5be   :  { %347 = vadd.xlane.f32.xlu2 %v346_v55 }
 0x5c6   :  { %114 = vadd.xlane.f32.xlu2 %v113_v59 }
 0x629   :  { %v330_v60 = vpop.xlane.xlu2 %329 }
 0x62a   :  { %v331_v62 = vsel %vm327_vm15, %v330_v60, %v317_v49  ;;  %vm401_vm15 = vcmp.eq.s32.totalorder %v851_v2, 17 }
 0x62b   :  { %v342_v63 = vmul.f32 %v338_v53, %v331_v62 }
 0x62d   :  { %343 = vadd.xlane.f32.xlu1 %v342_v63 }
 0x631   :  { %v348_v1 = vpop.xlane.xlu2 %347 }
 0x632   :  { %v349_v6 = vsel %vm341_vm3, %v348_v1, %v335_v54 }
 0x633   :  { %v360_v7 = vmul.f32 %v352_v4, %v349_v6 }
 0x635   :  { %361 = vadd.xlane.f32.xlu1 %v360_v7 }
 0x639   :  { %v919_v8 = vpop.xlane.xlu2 %114 }
 0x63a   :  { %832 = vrcp.f32 %v919_v8  ;;  %v130_v11 = vand.u32 2147483648, %v919_v8  ;;  %vm124_vm6 = vweird.f32 %v919_v8  ;;  %v128_v13 = vand.u32 2147483647, %v919_v8 }
 0x63c   :  { %v131_v15 = vor.u32 1.1754944e-38, %v130_v11  ;;  %vm129_vm10 = vcmp.eq.f32.partialorder %v128_v13, 8.507059e+37 }
 0x640   :  { %v833_v9 = vpop.eup %832 }
 0x641   :  { %v120_v10 = vmul.f32 %v833_v9, %v919_v8  ;;  %vm125_vm7 = vweird.f32 %v833_v9 }
 0x642   :  { %vm126_vm9 = vmor %vm124_vm6, %vm125_vm7  ;;  %vm473_vm7 = vcmp.eq.s32.totalorder %v851_v2, 21 }
 0x643   :  { %v121_v12 = vsub.f32 1.0, %v120_v10 }
 0x645   :  { %v122_v14 = vmul.f32 %v833_v9, %v121_v12 }
 0x647   :  { %v123_v17 = vadd.f32 %v833_v9, %v122_v14 }
 0x649   :  { %v127_v19 = vsel %vm126_vm9, %v833_v9, %v123_v17  ;;  %vm491_vm9 = vcmp.eq.s32.totalorder %v851_v2, 22 }
 0x64a   :  { %v931_v20 = vsel %vm129_vm10, %v131_v15, %v127_v19 }
 0x64b   :  { %v133_v21 = vmul.f32 %v931_v20, %v118_v18 }
 0x64d   :  { %134 = vst [vmem:[#allocation2 + $0x10] sm:$0xff] %v133_v21 }
 0x654   :  { %v379_v29 = vld [vmem:[#allocation2 + $0x10] ss:$0 sm:$0xff]  ;;  %v397_v40 = vld [vmem:[#allocation2 + $0x11] ss:$0 sm:$0xff]  ;;  %v415_v52 = vld [vmem:[#allocation2 + $0x12] ss:$0 sm:$0xff] }
 0x655   :  { %v380_v31 = vxor.u32 2147483648, %v379_v29  ;;  %v398_v41 = vxor.u32 2147483648, %v397_v40  ;;  %v416_v54 = vxor.u32 2147483648, %v415_v52  ;;  %v433_v1 = vld [vmem:[#allocation2 + $0x13] ss:$0 sm:$0xff] }
 0x656   :  { %v451_v17 = vld [vmem:[#allocation2 + $0x14] ss:$0 sm:$0xff]  ;;  %v469_v29 = vld [vmem:[#allocation2 + $0x15] ss:$0 sm:$0xff]  ;;  %v487_v40 = vld [vmem:[#allocation2 + $0x16] ss:$0 sm:$0xff] }
 0x657   :  { %v392_v33 = vmul.f32 %v380_v31, %v188_v32  ;;  %v452_v19 = vxor.u32 2147483648, %v451_v17 }
 0x6a0   :  { %v344_v22 = vpop.xlane.xlu1 %343 }
 0x6a1   :  { %v345_v23 = vsel %vm341_vm3, %v344_v22, %v331_v62  ;;  %vm437_vm3 = vcmp.eq.s32.totalorder %v851_v2, 19 }
 0x6a2   :  { %v356_v24 = vmul.f32 %v352_v4, %v345_v23 }
 0x6a4   :  { %357 = vadd.xlane.f32.xlu0 %v356_v24 }
 0x6a8   :  { %v362_v26 = vpop.xlane.xlu1 %361 }
 0x6a9   :  { %v363_v28 = vsel %vm355_vm11, %v362_v26, %v349_v6  ;;  %v434_v6 = vxor.u32 2147483648, %v433_v1 }
 0x6aa   :  { %v374_v30 = vmul.f32 %v366_v27, %v363_v28 }
 0x6ac   :  { %375 = vadd.xlane.f32.xlu1 %v374_v30 }
 0x6b4   :  { %393 = vadd.xlane.f32.xlu1 %v392_v33 }
 0x717   :  { %v358_v34 = vpop.xlane.xlu0 %357 }
 0x718   :  { %v359_v35 = vsel %vm355_vm11, %v358_v34, %v345_v23 }
 0x719   :  { %v370_v36 = vmul.f32 %v366_v27, %v359_v35 }
 0x71b   :  { %371 = vadd.xlane.f32.xlu0 %v370_v36 }
 0x71f   :  { %v376_v37 = vpop.xlane.xlu1 %375 }
 0x720   :  { %v377_v38 = vsel %vm369_vm13, %v376_v37, %v363_v28 }
 0x721   :  { %v388_v39 = vmul.f32 %v380_v31, %v377_v38 }
 0x723   :  { %389 = vadd.xlane.f32.xlu0 %v388_v39 }
 0x727   :  { %v394_v42 = vpop.xlane.xlu1 %393 }
 0x728   :  { %v395_v43 = vsel %vm383_vm14, %v394_v42, %v188_v32  ;;  %v488_v42 = vxor.u32 2147483648, %v487_v40 }
 0x729   :  { %v410_v44 = vmul.f32 %v398_v41, %v395_v43 }
 0x72b   :  { %411 = vadd.xlane.f32.xlu1 %v410_v44 }
 0x78e   :  { %v372_v45 = vpop.xlane.xlu0 %371 }
 0x78f   :  { %v373_v46 = vsel %vm369_vm13, %v372_v45, %v359_v35 }
 0x790   :  { %v384_v48 = vmul.f32 %v380_v31, %v373_v46  ;;  %v470_v31 = vxor.u32 2147483648, %v469_v29 }
 0x792   :  { %385 = vadd.xlane.f32.xlu2 %v384_v48 }
 0x796   :  { %v390_v49 = vpop.xlane.xlu0 %389 }
 0x797   :  { %v391_v50 = vsel %vm383_vm14, %v390_v49, %v377_v38 }
 0x798   :  { %v406_v51 = vmul.f32 %v398_v41, %v391_v50 }
 0x79a   :  { %407 = vadd.xlane.f32.xlu0 %v406_v51 }
 0x79e   :  { %v412_v53 = vpop.xlane.xlu1 %411 }
 0x79f   :  { %v413_v55 = vsel %vm401_vm15, %v412_v53, %v395_v43 }
 0x7a0   :  { %v428_v56 = vmul.f32 %v416_v54, %v413_v55 }
 0x7a2   :  { %429 = vadd.xlane.f32.xlu1 %v428_v56  ;;  %v505_v56 = vld [vmem:[#allocation2 + $0x17] ss:$0 sm:$0xff] }
 0x805   :  { %v386_v57 = vpop.xlane.xlu2 %385 }
 0x806   :  { %v387_v59 = vsel %vm383_vm14, %v386_v57, %v373_v46  ;;  %v42_v57 = vld [vmem:[%s1040_s0 + $0x18] sm:$0xff] }
 0x807   :  { %v402_v60 = vmul.f32 %v398_v41, %v387_v59 }
 0x809   :  { %403 = vadd.xlane.f32.xlu2 %v402_v60  ;;  %v506_v60 = vxor.u32 2147483648, %v505_v56 }
 0x80d   :  { %v408_v62 = vpop.xlane.xlu0 %407 }
 0x80e   :  { %v409_v63 = vsel %vm401_vm15, %v408_v62, %v391_v50 }
 0x80f   :  { %v424_v0 = vmul.f32 %v416_v54, %v409_v63 }
 0x811   :  { %425 = vadd.xlane.f32.xlu0 %v424_v0 }
 0x815   :  { %v430_v4 = vpop.xlane.xlu1 %429 }
 0x816   :  { %v431_v7 = vsel %vm419_vm2, %v430_v4, %v413_v55  ;;  %v139_v55 = vadd.s32 24, %v853_v3 }
 0x817   :  { %v446_v9 = vmul.f32 %v434_v6, %v431_v7 }
 0x818   :  { %vm140_vm8 = vcmp.eq.s32.totalorder %v139_v55, %v851_v2  ;;  %vm145_vm10 = vcmp.ge.s32.totalorder %v139_v55, %v851_v2 }
 0x819   :  { %447 = vadd.xlane.f32.xlu1 %v446_v9  ;;  %vm146_vm13 = vmand %vm145_vm10, %vm49_vm1  ;;  %vm194_vm1 = vcmp.eq.s32.totalorder %v851_v2, %v139_v55  ;;  %vm637_vm10 = vcmp.eq.s32.totalorder %v851_v2, 29 }
 0x87c   :  { %v404_v10 = vpop.xlane.xlu2 %403 }
 0x87d   :  { %v405_v11 = vsel %vm401_vm15, %v404_v10, %v387_v59 }
 0x87e   :  { %v420_v12 = vmul.f32 %v416_v54, %v405_v11 }
 0x880   :  { %421 = vadd.xlane.f32.xlu2 %v420_v12 }
 0x884   :  { %v426_v13 = vpop.xlane.xlu0 %425 }
 0x885   :  { %v427_v14 = vsel %vm419_vm2, %v426_v13, %v409_v63  ;;  %v142_v63 = vsel %vm140_vm8, %v42_v57, 0.0  ;;  %vm593_vm8 = vcmp.eq.s32.totalorder %v851_v2, 27 }
 0x886   :  { %v442_v15 = vmul.f32 %v434_v6, %v427_v14 }
 0x888   :  { %443 = vadd.xlane.f32.xlu0 %v442_v15 }
 0x88c   :  { %v448_v18 = vpop.xlane.xlu1 %447 }
 0x88d   :  { %v449_v21 = vsel %vm437_vm3, %v448_v18, %v431_v7 }
 0x88e   :  { %v464_v22 = vmul.f32 %v452_v19, %v449_v21 }
 0x890   :  { %465 = vadd.xlane.f32.xlu1 %v464_v22 }
 0x8f3   :  { %v422_v23 = vpop.xlane.xlu2 %421 }
 0x8f4   :  { %v423_v24 = vsel %vm419_vm2, %v422_v23, %v405_v11  ;;  %vm509_vm2 = vcmp.eq.s32.totalorder %v851_v2, 23 }
 0x8f5   :  { %v438_v25 = vmul.f32 %v434_v6, %v423_v24 }
 0x8f7   :  { %439 = vadd.xlane.f32.xlu2 %v438_v25 }
 0x8fb   :  { %v444_v26 = vpop.xlane.xlu0 %443 }
 0x8fc   :  { %v445_v27 = vsel %vm437_vm3, %v444_v26, %v427_v14 }
 0x8fd   :  { %v460_v28 = vmul.f32 %v452_v19, %v445_v27 }
 0x8ff   :  { %461 = vadd.xlane.f32.xlu0 %v460_v28 }
 0x903   :  { %v466_v30 = vpop.xlane.xlu1 %465 }
 0x904   :  { %v467_v32 = vsel %vm455_vm4, %v466_v30, %v449_v21  ;;  %v147_v21 = vsel %vm146_vm13, %v42_v57, 0.0  ;;  %vm681_vm13 = vcmp.eq.s32.totalorder %v851_v2, 31 }
 0x905   :  { %v482_v33 = vmul.f32 %v470_v31, %v467_v32 }
 0x907   :  { %483 = vadd.xlane.f32.xlu1 %v482_v33 }
 0x96a   :  { %v440_v34 = vpop.xlane.xlu2 %439 }
 0x96b   :  { %v441_v35 = vsel %vm437_vm3, %v440_v34, %v423_v24  ;;  %vm527_vm3 = vcmp.eq.s32.totalorder %v851_v2, 24 }
 0x96c   :  { %v456_v36 = vmul.f32 %v452_v19, %v441_v35 }
 0x96e   :  { %457 = vadd.xlane.f32.xlu2 %v456_v36  ;;  %v195_v36 = vsel %vm194_vm1, -1.0, %v837_v61 }
 0x972   :  { %v462_v37 = vpop.xlane.xlu0 %461 }
 0x973   :  { %v463_v38 = vsel %vm455_vm4, %v462_v37, %v445_v27 }
 0x974   :  { %v478_v39 = vmul.f32 %v470_v31, %v463_v38 }
 0x976   :  { %479 = vadd.xlane.f32.xlu0 %v478_v39 }
 0x97a   :  { %v484_v41 = vpop.xlane.xlu1 %483 }
 0x97b   :  { %v485_v43 = vsel %vm473_vm7, %v484_v41, %v467_v32 }
 0x97c   :  { %v500_v44 = vmul.f32 %v488_v42, %v485_v43 }
 0x97e   :  { %501 = vadd.xlane.f32.xlu1 %v500_v44 }
 0x9e1   :  { %v458_v45 = vpop.xlane.xlu2 %457 }
 0x9e2   :  { %v459_v46 = vsel %vm455_vm4, %v458_v45, %v441_v35  ;;  %vm549_vm4 = vcmp.eq.s32.totalorder %v851_v2, 25 }
 0x9e3   :  { %v474_v48 = vmul.f32 %v470_v31, %v459_v46 }
 0x9e5   :  { %475 = vadd.xlane.f32.xlu2 %v474_v48 }
 0x9e9   :  { %v480_v49 = vpop.xlane.xlu0 %479 }
 0x9ea   :  { %v481_v50 = vsel %vm473_vm7, %v480_v49, %v463_v38 }
 0x9eb   :  { %v496_v51 = vmul.f32 %v488_v42, %v481_v50 }
 0x9ed   :  { %497 = vadd.xlane.f32.xlu0 %v496_v51 }
 0x9f1   :  { %v502_v1 = vpop.xlane.xlu1 %501 }
 0x9f2   :  { %v503_v4 = vsel %vm491_vm9, %v502_v1, %v485_v43 }
 0x9f3   :  { %v518_v3 = vmul.f32 %v506_v60, %v503_v4 }
 0xa58   :  { %v476_v52 = vpop.xlane.xlu2 %475 }
 0xa59   :  { %v477_v53 = vsel %vm473_vm7, %v476_v52, %v459_v46  ;;  %vm571_vm7 = vcmp.eq.s32.totalorder %v851_v2, 26 }
 0xa5a   :  { %v492_v54 = vmul.f32 %v488_v42, %v477_v53 }
 0xa5c   :  { %493 = vadd.xlane.f32.xlu2 %v492_v54 }
 0xa60   :  { %v498_v59 = vpop.xlane.xlu0 %497 }
 0xa61   :  { %v499_v62 = vsel %vm491_vm9, %v498_v59, %v481_v50 }
 0xa62   :  { %v514_v0 = vmul.f32 %v506_v60, %v499_v62 }
 0xa64   :  { %143 = vadd.xlane.f32.xlu2 %v142_v63  ;;  %515 = vadd.xlane.f32.xlu1 %v514_v0 }
 0xa6c   :  { %519 = vadd.xlane.f32.xlu2 %v518_v3 }
 0xacf   :  { %v494_v6 = vpop.xlane.xlu2 %493 }
 0xad0   :  { %v495_v7 = vsel %vm491_vm9, %v494_v6, %v477_v53  ;;  %vm615_vm9 = vcmp.eq.s32.totalorder %v851_v2, 28 }
 0xad1   :  { %v510_v9 = vmul.f32 %v506_v60, %v495_v7 }
 0xad3   :  { %511 = vadd.xlane.f32.xlu0 %v510_v9 }
 0xad7   :  { %v982_v10 = vpop.xlane.xlu2 %143  ;;  %v516_v25 = vpop.xlane.xlu1 %515 }
 0xad8   :  { %834 = vrcp.f32 %v982_v10  ;;  %v159_v13 = vand.u32 2147483648, %v982_v10  ;;  %vm153_vm11 = vweird.f32 %v982_v10  ;;  %v157_v15 = vand.u32 2147483647, %v982_v10 }
 0xad9   :  { %v517_v29 = vsel %vm509_vm2, %v516_v25, %v499_v62 }
 0xada   :  { %v160_v18 = vor.u32 1.1754944e-38, %v159_v13  ;;  %vm158_vm15 = vcmp.eq.f32.partialorder %v157_v15, 8.507059e+37 }
 0xade   :  { %v835_v11 = vpop.eup %834 }
 0xadf   :  { %v149_v12 = vmul.f32 %v835_v11, %v982_v10  ;;  %vm154_vm12 = vweird.f32 %v835_v11  ;;  %v520_v26 = vpop.xlane.xlu2 %519 }
 0xae0   :  { %vm155_vm14 = vmor %vm153_vm11, %vm154_vm12  ;;  %v521_v30 = vsel %vm509_vm2, %v520_v26, %v503_v4  ;;  %vm659_vm12 = vcmp.eq.s32.totalorder %v851_v2, 30 }
 0xae1   :  { %v150_v14 = vsub.f32 1.0, %v149_v12 }
 0xae3   :  { %v151_v17 = vmul.f32 %v835_v11, %v150_v14 }
 0xae5   :  { %v152_v19 = vadd.f32 %v835_v11, %v151_v17 }
 0xae7   :  { %v156_v22 = vsel %vm155_vm14, %v835_v11, %v152_v19 }
 0xae8   :  { %v994_v23 = vsel %vm158_vm15, %v160_v18, %v156_v22 }
 0xae9   :  { %v162_v24 = vmul.f32 %v994_v23, %v147_v21 }
 0xaeb   :  { %163 = vst [vmem:[#allocation2 + $0x18] sm:$0xff] %v162_v24 }
 0xaf2   :  { %v523_v27 = vld [vmem:[#allocation2 + $0x18] ss:$0 sm:$0xff]  ;;  %v545_v38 = vld [vmem:[#allocation2 + $0x19] ss:$0 sm:$0xff]  ;;  %v567_v52 = vld [vmem:[#allocation2 + $0x1a] ss:$0 sm:$0xff] }
 0xaf3   :  { %v524_v28 = vxor.u32 2147483648, %v523_v27  ;;  %v546_v41 = vxor.u32 2147483648, %v545_v38  ;;  %v568_v55 = vxor.u32 2147483648, %v567_v52  ;;  %v589_v6 = vld [vmem:[#allocation2 + $0x1b] ss:$0 sm:$0xff] }
 0xaf4   :  { %v590_v11 = vxor.u32 2147483648, %v589_v6  ;;  %v611_v25 = vld [vmem:[#allocation2 + $0x1c] ss:$0 sm:$0xff] }
 0xaf5   :  { %v536_v31 = vmul.f32 %v524_v28, %v521_v30  ;;  %v532_v32 = vmul.f32 %v524_v28, %v517_v29  ;;  %v540_v37 = vmul.f32 %v524_v28, %v195_v36 }
 0xaf7   :  { %537 = vadd.xlane.f32.xlu2 %v536_v31  ;;  %533 = vadd.xlane.f32.xlu1 %v532_v32 }
 0xb46   :  { %v512_v33 = vpop.xlane.xlu0 %511 }
 0xb47   :  { %v513_v34 = vsel %vm509_vm2, %v512_v33, %v495_v7 }
 0xb48   :  { %v528_v35 = vmul.f32 %v524_v28, %v513_v34  ;;  %v612_v28 = vxor.u32 2147483648, %v611_v25 }
 0xb4a   :  { %529 = vadd.xlane.f32.xlu0 %v528_v35 }
 0xb52   :  { %541 = vadd.xlane.f32.xlu0 %v540_v37 }
 0xb6a   :  { %v538_v39 = vpop.xlane.xlu2 %537  ;;  %v534_v40 = vpop.xlane.xlu1 %533 }
 0xb6b   :  { %v539_v42 = vsel %vm527_vm3, %v538_v39, %v521_v30  ;;  %v535_v43 = vsel %vm527_vm3, %v534_v40, %v517_v29  ;;  %v633_v39 = vld [vmem:[#allocation2 + $0x1d] ss:$0 sm:$0xff] }
 0xb6c   :  { %v554_v44 = vmul.f32 %v546_v41, %v535_v43  ;;  %v558_v45 = vmul.f32 %v546_v41, %v539_v42 }
 0xb6e   :  { %555 = vadd.xlane.f32.xlu2 %v554_v44  ;;  %559 = vadd.xlane.f32.xlu0 %v558_v45 }
 0xbbd   :  { %v530_v46 = vpop.xlane.xlu0 %529 }
 0xbbe   :  { %v531_v48 = vsel %vm527_vm3, %v530_v46, %v513_v34 }
 0xbbf   :  { %v550_v49 = vmul.f32 %v546_v41, %v531_v48 }
 0xbc1   :  { %551 = vadd.xlane.f32.xlu1 %v550_v49 }
 0xbc5   :  { %v542_v50 = vpop.xlane.xlu0 %541 }
 0xbc6   :  { %v543_v61 = vsel %vm527_vm3, %v542_v50, %v195_v36 }
 0xbc7   :  { %v562_v51 = vmul.f32 %v546_v41, %v543_v61 }
 0xbc9   :  { %563 = vadd.xlane.f32.xlu1 %v562_v51 }
 0xbe1   :  { %v556_v53 = vpop.xlane.xlu2 %555  ;;  %v560_v54 = vpop.xlane.xlu0 %559 }
 0xbe2   :  { %v557_v56 = vsel %vm549_vm4, %v556_v53, %v535_v43  ;;  %v561_v57 = vsel %vm549_vm4, %v560_v54, %v539_v42  ;;  %v634_v42 = vxor.u32 2147483648, %v633_v39  ;;  %v655_v53 = vld [vmem:[#allocation2 + $0x1e] ss:$0 sm:$0xff] }
 0xbe3   :  { %v576_v59 = vmul.f32 %v568_v55, %v557_v56  ;;  %v580_v60 = vmul.f32 %v568_v55, %v561_v57 }
 0xbe5   :  { %577 = vadd.xlane.f32.xlu0 %v576_v59  ;;  %581 = vadd.xlane.f32.xlu1 %v580_v60 }
 0xc34   :  { %v552_v62 = vpop.xlane.xlu1 %551 }
 0xc35   :  { %v553_v63 = vsel %vm549_vm4, %v552_v62, %v531_v48 }
 0xc36   :  { %v572_v0 = vmul.f32 %v568_v55, %v553_v63 }
 0xc38   :  { %573 = vadd.xlane.f32.xlu2 %v572_v0 }
 0xc3c   :  { %v564_v1 = vpop.xlane.xlu1 %563 }
 0xc3d   :  { %v565_v4 = vsel %vm549_vm4, %v564_v1, %v543_v61 }
 0xc3e   :  { %v584_v3 = vmul.f32 %v568_v55, %v565_v4 }
 0xc40   :  { %585 = vadd.xlane.f32.xlu2 %v584_v3 }
 0xc58   :  { %v582_v7 = vpop.xlane.xlu1 %581  ;;  %v578_v9 = vpop.xlane.xlu0 %577 }
 0xc59   :  { %v583_v12 = vsel %vm571_vm7, %v582_v7, %v561_v57  ;;  %v579_v13 = vsel %vm571_vm7, %v578_v9, %v557_v56  ;;  %v656_v56 = vxor.u32 2147483648, %v655_v53  ;;  %v677_v7 = vld [vmem:[#allocation2 + $0x1f] ss:$0 sm:$0xff] }
 0xc5a   :  { %v602_v14 = vmul.f32 %v590_v11, %v583_v12  ;;  %v598_v15 = vmul.f32 %v590_v11, %v579_v13 }
 0xc5c   :  { %603 = vadd.xlane.f32.xlu2 %v602_v14  ;;  %599 = vadd.xlane.f32.xlu1 %v598_v15 }
 0xcab   :  { %v574_v17 = vpop.xlane.xlu2 %573 }
 0xcac   :  { %v575_v18 = vsel %vm571_vm7, %v574_v17, %v553_v63 }
 0xcad   :  { %v594_v19 = vmul.f32 %v590_v11, %v575_v18 }
 0xcaf   :  { %595 = vadd.xlane.f32.xlu0 %v594_v19 }
 0xcb3   :  { %v586_v21 = vpop.xlane.xlu2 %585 }
 0xcb4   :  { %v587_v22 = vsel %vm571_vm7, %v586_v21, %v565_v4 }
 0xcb5   :  { %v606_v24 = vmul.f32 %v590_v11, %v587_v22 }
 0xcb7   :  { %607 = vadd.xlane.f32.xlu0 %v606_v24 }
 0xccf   :  { %v604_v26 = vpop.xlane.xlu2 %603  ;;  %v600_v27 = vpop.xlane.xlu1 %599 }
 0xcd0   :  { %v605_v29 = vsel %vm593_vm8, %v604_v26, %v583_v12  ;;  %v601_v30 = vsel %vm593_vm8, %v600_v27, %v579_v13  ;;  %v678_v12 = vxor.u32 2147483648, %v677_v7 }
 0xcd1   :  { %v624_v31 = vmul.f32 %v612_v28, %v605_v29  ;;  %v620_v32 = vmul.f32 %v612_v28, %v601_v30 }
 0xcd3   :  { %625 = vadd.xlane.f32.xlu0 %v624_v31  ;;  %621 = vadd.xlane.f32.xlu2 %v620_v32 }
 0xd22   :  { %v596_v33 = vpop.xlane.xlu0 %595 }
 0xd23   :  { %v597_v34 = vsel %vm593_vm8, %v596_v33, %v575_v18 }
 0xd24   :  { %v616_v35 = vmul.f32 %v612_v28, %v597_v34 }
 0xd26   :  { %617 = vadd.xlane.f32.xlu1 %v616_v35 }
 0xd2a   :  { %v608_v36 = vpop.xlane.xlu0 %607 }
 0xd2b   :  { %v609_v37 = vsel %vm593_vm8, %v608_v36, %v587_v22 }
 0xd2c   :  { %v628_v38 = vmul.f32 %v612_v28, %v609_v37 }
 0xd2e   :  { %629 = vadd.xlane.f32.xlu1 %v628_v38 }
 0xd46   :  { %v622_v40 = vpop.xlane.xlu2 %621  ;;  %v626_v41 = vpop.xlane.xlu0 %625 }
 0xd47   :  { %v623_v43 = vsel %vm615_vm9, %v622_v40, %v601_v30  ;;  %v627_v44 = vsel %vm615_vm9, %v626_v41, %v605_v29 }
 0xd48   :  { %v642_v45 = vmul.f32 %v634_v42, %v623_v43  ;;  %v646_v46 = vmul.f32 %v634_v42, %v627_v44 }
 0xd4a   :  { %643 = vadd.xlane.f32.xlu0 %v642_v45  ;;  %647 = vadd.xlane.f32.xlu1 %v646_v46 }
 0xd99   :  { %v618_v48 = vpop.xlane.xlu1 %617 }
 0xd9a   :  { %v619_v49 = vsel %vm615_vm9, %v618_v48, %v597_v34 }
 0xd9b   :  { %v638_v50 = vmul.f32 %v634_v42, %v619_v49 }
 0xd9d   :  { %639 = vadd.xlane.f32.xlu2 %v638_v50 }
 0xda1   :  { %v630_v61 = vpop.xlane.xlu1 %629 }
 0xda2   :  { %v631_v51 = vsel %vm615_vm9, %v630_v61, %v609_v37 }
 0xda3   :  { %v650_v52 = vmul.f32 %v634_v42, %v631_v51 }
 0xda5   :  { %651 = vadd.xlane.f32.xlu2 %v650_v52 }
 0xdbd   :  { %v648_v54 = vpop.xlane.xlu1 %647  ;;  %v644_v55 = vpop.xlane.xlu0 %643 }
 0xdbe   :  { %v649_v57 = vsel %vm637_vm10, %v648_v54, %v627_v44  ;;  %v645_v59 = vsel %vm637_vm10, %v644_v55, %v623_v43 }
 0xdbf   :  { %v668_v60 = vmul.f32 %v656_v56, %v649_v57  ;;  %v664_v62 = vmul.f32 %v656_v56, %v645_v59 }
 0xdc1   :  { %669 = vadd.xlane.f32.xlu2 %v668_v60  ;;  %665 = vadd.xlane.f32.xlu1 %v664_v62 }
 0xe10   :  { %v640_v63 = vpop.xlane.xlu2 %639 }
 0xe11   :  { %v641_v0 = vsel %vm637_vm10, %v640_v63, %v619_v49 }
 0xe12   :  { %v660_v1 = vmul.f32 %v656_v56, %v641_v0 }
 0xe14   :  { %661 = vadd.xlane.f32.xlu0 %v660_v1 }
 0xe18   :  { %v652_v4 = vpop.xlane.xlu2 %651 }
 0xe19   :  { %v653_v3 = vsel %vm637_vm10, %v652_v4, %v631_v51 }
 0xe1a   :  { %v672_v6 = vmul.f32 %v656_v56, %v653_v3 }
 0xe1c   :  { %673 = vadd.xlane.f32.xlu0 %v672_v6 }
 0xe34   :  { %v670_v9 = vpop.xlane.xlu2 %669  ;;  %v666_v11 = vpop.xlane.xlu1 %665 }
 0xe35   :  { %v671_v13 = vsel %vm659_vm12, %v670_v9, %v649_v57  ;;  %v667_v14 = vsel %vm659_vm12, %v666_v11, %v645_v59 }
 0xe36   :  { %v690_v15 = vmul.f32 %v678_v12, %v671_v13  ;;  %v686_v17 = vmul.f32 %v678_v12, %v667_v14 }
 0xe38   :  { %691 = vadd.xlane.f32.xlu0 %v690_v15  ;;  %687 = vadd.xlane.f32.xlu2 %v686_v17 }
 0xe87   :  { %v662_v18 = vpop.xlane.xlu0 %661 }
 0xe88   :  { %v663_v19 = vsel %vm659_vm12, %v662_v18, %v641_v0 }
 0xe89   :  { %v682_v21 = vmul.f32 %v678_v12, %v663_v19 }
 0xe8b   :  { %683 = vadd.xlane.f32.xlu1 %v682_v21 }
 0xe8f   :  { %v674_v22 = vpop.xlane.xlu0 %673 }
 0xe90   :  { %v675_v24 = vsel %vm659_vm12, %v674_v22, %v653_v3 }
 0xe91   :  { %v694_v25 = vmul.f32 %v678_v12, %v675_v24 }
 0xe93   :  { %695 = vadd.xlane.f32.xlu1 %v694_v25 }
 0xeab   :  { %v688_v26 = vpop.xlane.xlu2 %687  ;;  %v692_v27 = vpop.xlane.xlu0 %691 }
 0xeac   :  { %v689_v28 = vsel %vm681_vm13, %v688_v26, %v667_v14  ;;  %v693_v29 = vsel %vm681_vm13, %v692_v27, %v671_v13 }
 0xead   :  { %v730_v30 = vmul.f32 %v689_v28, %v898_v58  ;;  %v749_v31 = vmul.f32 %v693_v29, %v931_v20 }
 0xeaf   :  { %v732_v32 = vsel %vm95_vm0, %v689_v28, %v730_v30  ;;  %v751_v33 = vsel %vm124_vm6, %v693_v29, %v749_v31 }
 0xeb0   :  { %810 = vst [vmem:[%s1041_s1 + $0x8] sm:$0xff] %v732_v32 }
 0xeb1   :  { %812 = vst [vmem:[%s1041_s1 + $0x10] sm:$0xff] %v751_v33 }
 0xefe   :  { %v684_v34 = vpop.xlane.xlu1 %683 }
 0xeff   :  { %v685_v58 = vsel %vm681_vm13, %v684_v34, %v663_v19 }
 0xf00   :  { %v712_v20 = vmul.f32 %v685_v58, %v871_v16 }
 0xf02   :  { %v714_v47 = vsel %vm66_vm5, %v685_v58, %v712_v20 }
 0xf03   :  { %808 = vst [vmem:[%s1041_s1] sm:$0xff] %v714_v47 }
 0xf06   :  { %v696_v8 = vpop.xlane.xlu1 %695 }
 0xf07   :  { %v697_v35 = vsel %vm681_vm13, %v696_v8, %v675_v24 }
 0xf08   :  { %v768_v36 = vmul.f32 %v697_v35, %v994_v23 }
 0xf0a   :  { %v770_v37 = vsel %vm153_vm11, %v697_v35, %v768_v36 }
 0xf0b   :  { %814 = vst [vmem:[%s1041_s1 + $0x18] sm:$0xff] %v770_v37 }

// kernel: srnn_forward.1
= control target key start
LH: loop header
LB: loop body
LE: loop exit
PB: predicated region body
PF: predicated region fallthrough
CT: control target
= control target key end

     0   :  { %s927_s24 = smov 0   ;;  %s929_s25 = smov 0   ;;  %s1328_s0 = inlined_call_operand.vmem [shape: f32[8,8,128], index: 0, kind: input, shape index: {}]   ;;  %s1329_s1 = inlined_call_operand.vmem [shape: f32[8,128], index: 1, kind: input, shape index: {}]   ;;  %s1330_s2 = inlined_call_operand.vmem [shape: f32[128,128], index: 2, kind: input, shape index: {}]   ;;  %s1331_s3 = inlined_call_operand.vmem [shape: f32[128,128], index: 3, kind: input, shape index: {}]   ;;  %s1332_s4 = inlined_call_operand.vmem [shape: f32[128,128], index: 4, kind: input, shape index: {}]   ;;  %s1333_s5 = inlined_call_operand.vmem [shape: f32[1,128], index: 5, kind: input, shape index: {}]   ;;  %s1334_s6 = inlined_call_operand.vmem [shape: f32[8,8,128], index: 6, kind: output, shape index: {0}]   ;;  %s1335_s7 = inlined_call_operand.vmem [shape: f32[8,8,128], index: 7, kind: output, shape index: {1}]  }
   0x1   :  { %s931_s26 = smov 0  }
   0x2 LB: > { %s27_s27 = sadd.s32 1, %s881_s25  ;;  %p819_p0 = scmp.ge.s32.totalorder %s885_s26, 1  ;;  %s885_s26 = sphi %s931_s26, %s18_s26   ;;  %s881_s25 = sphi %s929_s25, %s1337_s25   ;;  %s877_s24 = sphi %s927_s24, %s1336_s24  }
   0x3   : > { %p28_p1 = scmp.ge.s32.totalorder %s27_s27, 2  ;;  %p271_p2 = scmp.lt.s32.totalorder %s885_s26, 3 }
   0x5   : > { %s1339_s27 = smov (%p28_p1, %s27_s27), 0  ;;  %p272_p3 = pnand %p819_p0, %p271_p2 }
   0x6   : > { %s820_s28 = sshll.u32 (!%p272_p3), %s877_s24, 2  ;;  %p826_p5 = scmp.ne.s32.totalorder (!%p272_p3), %s877_s24, 0 }
   0x7   : > { %275 = sbr.rel (%p272_p3) target bundleno = 1100 (0x44c), region = 44  ;;  %p322_p4 = scmp.lt.s32.totalorder (!%p272_p3), %s820_s28, 7 }
   0xc   : > { %s1341_s28 = smov (!%p322_p4, %s820_s28), 7  ;;  %355 = sbr.rel (%p826_p5) target bundleno = 19 (0x13), region = 48 }
   0xd   : > { %s821_s29 = sshll.u32 %s1341_s28, 3 }
   0xe   : > { %s948_s9 = scalar_lea.vmem %s1328_s0, %s821_s29  ;;  %s953_s12 = scalar_lea.vmem %s1334_s6, %s821_s29 }
   0xf   : > { %s958_s15 = scalar_lea.vmem %s1335_s7, %s821_s29 }
  0x11   : > { %v356_v0 = vld [vmem:[%s1329_s1] sm:$0xff] }
  0x12   : > { %357 = vst [vmem:[#allocation2] sm:$0xff] %v356_v0 }
  0x13 PF: > { %v966_v1 = vld [vmem:[%s1330_s2 + $0x78] sm:$0xff]  ;;  %v971_v2 = vld [vmem:[%s1330_s2 + $0x70] sm:$0xff]  ;;  %v977_v3 = vld [vmem:[%s1330_s2 + $0x68] sm:$0xff] }
  0x14   : > { %434 = vmatpush.msra.mxu1 %v966_v1  ;;  %v983_v4 = vld [vmem:[%s1330_s2 + $0x60] sm:$0xff]  ;;  %v991_v6 = vld [vmem:[%s1331_s3 + $0x78] sm:$0xff]  ;;  %v1004_v8 = vld [vmem:[%s1331_s3 + $0x70] sm:$0xff] }
  0x15   : > { %v996_v7 = vld [vmem:[%s1330_s2 + $0x58] sm:$0xff]  ;;  %455 = vmatpush.msra.mxu2 %v991_v6  ;;  %v1010_v9 = vld [vmem:[%s1331_s3 + $0x68] sm:$0xff]  ;;  %v1015_v10 = vld [vmem:[%s1330_s2 + $0x50] sm:$0xff] }
  0x16   : > { %435 = vmatpush.msra.mxu1 %v971_v2  ;;  %v1022_v11 = vld [vmem:[%s1331_s3 + $0x60] sm:$0xff]  ;;  %v1027_v12 = vld [vmem:[%s1330_s2 + $0x48] sm:$0xff]  ;;  %v1034_v13 = vld [vmem:[%s1331_s3 + $0x58] sm:$0xff] }
  0x17   : > { %456 = vmatpush.msra.mxu2 %v1004_v8  ;;  %v1039_v14 = vld [vmem:[%s1330_s2 + $0x40] sm:$0xff]  ;;  %v1046_v15 = vld [vmem:[%s1331_s3 + $0x50] sm:$0xff]  ;;  %v1051_v16 = vld [vmem:[%s1330_s2 + $0x38] sm:$0xff] }
  0x18   : > { %436 = vmatpush.msra.mxu1 %v977_v3  ;;  %v1058_v17 = vld [vmem:[%s1331_s3 + $0x48] sm:$0xff]  ;;  %v1063_v18 = vld [vmem:[%s1330_s2 + $0x30] sm:$0xff]  ;;  %v1070_v19 = vld [vmem:[%s1331_s3 + $0x40] sm:$0xff] }
  0x19   : > { %v986_v5 = vld [vmem:[#allocation2] sm:$0xff]  ;;  %457 = vmatpush.msra.mxu2 %v1010_v9  ;;  %v1075_v20 = vld [vmem:[%s1330_s2 + $0x28] sm:$0xff]  ;;  %v1082_v21 = vld [vmem:[%s1331_s3 + $0x38] sm:$0xff] }
  0x1a   : > { %411 = vst [vmem:[%s958_s15] sm:$0xff] %v986_v5  ;;  %437 = vmatpush.msra.mxu1 %v983_v4  ;;  %v1087_v22 = vld [vmem:[%s1330_s2 + $0x20] sm:$0xff]  ;;  %v1094_v23 = vld [vmem:[%s1331_s3 + $0x30] sm:$0xff]  ;;  %v1099_v24 = vld [vmem:[%s1330_s2 + $0x18] sm:$0xff] }
  0x1b   : > { %458 = vmatpush.msra.mxu2 %v1022_v11  ;;  %v1106_v25 = vld [vmem:[%s1331_s3 + $0x28] sm:$0xff]  ;;  %v1111_v26 = vld [vmem:[%s1330_s2 + $0x10] sm:$0xff]  ;;  %v1118_v27 = vld [vmem:[%s1331_s3 + $0x20] sm:$0xff] }
  0x1c   : > { %438 = vmatpush.msra.mxu1 %v996_v7  ;;  %v1123_v28 = vld [vmem:[%s1330_s2 + $0x8] sm:$0xff]  ;;  %v1130_v29 = vld [vmem:[%s1331_s3 + $0x18] sm:$0xff]  ;;  %v1135_v30 = vld [vmem:[%s1330_s2] sm:$0xff] }
  0x1d   : > { %459 = vmatpush.msra.mxu2 %v1034_v13  ;;  %v1158_v31 = vld [vmem:[%s1331_s3 + $0x10] sm:$0xff]  ;;  %v1165_v32 = vld [vmem:[%s1331_s3 + $0x8] sm:$0xff]  ;;  %v1172_v33 = vld [vmem:[%s1331_s3] sm:$0xff] }
  0x1e   : > { %439 = vmatpush.msra.mxu1 %v1015_v10  ;;  %v405_v34 = vld [vmem:[%s1332_s4 + $0x78] sm:$0xff]  ;;  %v404_v35 = vld [vmem:[%s1332_s4 + $0x70] sm:$0xff]  ;;  %v403_v36 = vld [vmem:[%s1332_s4 + $0x68] sm:$0xff] }
  0x1f   : > { %460 = vmatpush.msra.mxu2 %v1046_v15  ;;  %412 = vmatpush.msra.mxu0 %v405_v34  ;;  %v402_v37 = vld [vmem:[%s1332_s4 + $0x60] sm:$0xff]  ;;  %v401_v38 = vld [vmem:[%s1332_s4 + $0x58] sm:$0xff]  ;;  %v400_v39 = vld [vmem:[%s1332_s4 + $0x50] sm:$0xff] }
  0x20   : > { %440 = vmatpush.msra.mxu1 %v1027_v12  ;;  %477 = vmatpush.msra.mxu3 %v405_v34  ;;  %v399_v40 = vld [vmem:[%s1332_s4 + $0x48] sm:$0xff]  ;;  %v398_v41 = vld [vmem:[%s1332_s4 + $0x40] sm:$0xff]  ;;  %v397_v42 = vld [vmem:[%s1332_s4 + $0x38] sm:$0xff] }
  0x21   : > { %461 = vmatpush.msra.mxu2 %v1058_v17  ;;  %413 = vmatpush.msra.mxu0 %v404_v35  ;;  %v396_v43 = vld [vmem:[%s1332_s4 + $0x30] sm:$0xff]  ;;  %v395_v44 = vld [vmem:[%s1332_s4 + $0x28] sm:$0xff]  ;;  %v394_v45 = vld [vmem:[%s1332_s4 + $0x20] sm:$0xff] }
  0x22   : > { %441 = vmatpush.msra.mxu1 %v1039_v14  ;;  %478 = vmatpush.msra.mxu3 %v404_v35  ;;  %v393_v46 = vld [vmem:[%s1332_s4 + $0x18] sm:$0xff]  ;;  %v392_v47 = vld [vmem:[%s1332_s4 + $0x10] sm:$0xff]  ;;  %v433_v48 = vld [vmem:[%s948_s9] sm:$0xff] }
  0x23   : > { %462 = vmatpush.msra.mxu2 %v1070_v19  ;;  %414 = vmatpush.msra.mxu0 %v403_v36  ;;  %v391_v49 = vld [vmem:[%s1332_s4 + $0x8] sm:$0xff]  ;;  %v390_v52 = vld [vmem:[%s1332_s4] sm:$0xff] }
  0x24   : > { %442 = vmatpush.msra.mxu1 %v1051_v16  ;;  %479 = vmatpush.msra.mxu3 %v403_v36  ;;  %v862_v54 = vld [vmem:[%s1333_s5] ss:$0 sm:$0xff]  ;;  %v829_v58 = vld [vmem:[%s948_s9 + $0x8] sm:$0xff] }
  0x25   : > { %463 = vmatpush.msra.mxu2 %v1082_v21  ;;  %415 = vmatpush.msra.mxu0 %v402_v37 }
  0x26   : > { %443 = vmatpush.msra.mxu1 %v1063_v18  ;;  %480 = vmatpush.msra.mxu3 %v402_v37 }
  0x27   : > { %464 = vmatpush.msra.mxu2 %v1094_v23  ;;  %416 = vmatpush.msra.mxu0 %v401_v38 }
  0x28   : > { %444 = vmatpush.msra.mxu1 %v1075_v20  ;;  %481 = vmatpush.msra.mxu3 %v401_v38 }
  0x29   : > { %465 = vmatpush.msra.mxu2 %v1106_v25  ;;  %417 = vmatpush.msra.mxu0 %v400_v39 }
  0x2a   : > { %445 = vmatpush.msra.mxu1 %v1087_v22  ;;  %482 = vmatpush.msra.mxu3 %v400_v39 }
  0x2b   : > { %466 = vmatpush.msra.mxu2 %v1118_v27  ;;  %418 = vmatpush.msra.mxu0 %v399_v40 }
  0x2c   : > { %446 = vmatpush.msra.mxu1 %v1099_v24  ;;  %483 = vmatpush.msra.mxu3 %v399_v40 }
  0x2d   : > { %467 = vmatpush.msra.mxu2 %v1130_v29  ;;  %419 = vmatpush.msra.mxu0 %v398_v41 }
  0x2e   : > { %447 = vmatpush.msra.mxu1 %v1111_v26  ;;  %484 = vmatpush.msra.mxu3 %v398_v41 }
  0x2f   : > { %468 = vmatpush.msra.mxu2 %v1158_v31  ;;  %420 = vmatpush.msra.mxu0 %v397_v42 }
  0x30   : > { %448 = vmatpush.msra.mxu1 %v1123_v28  ;;  %485 = vmatpush.msra.mxu3 %v397_v42 }
  0x31   : > { %469 = vmatpush.msra.mxu2 %v1165_v32  ;;  %421 = vmatpush.msra.mxu0 %v396_v43 }
  0x32   : > { %449 = vmatpush.msra.mxu1 %v1135_v30  ;;  %486 = vmatpush.msra.mxu3 %v396_v43 }
  0x33   : > { %450 = vmatmul.f32.vlgmr.msra.gmra.mxu1 %v986_v5  ;;  %470 = vmatpush.msra.mxu2 %v1172_v33 }
  0x34   : > { %522 = vmatpush.msrb.mxu1 %v991_v6  ;;  %422 = vmatpush.msra.mxu0 %v395_v44 }
  0x35   : > { %544 = vmatpush.msrb.mxu2 %v405_v34  ;;  %487 = vmatpush.msra.mxu3 %v395_v44 }
  0x36   : > { %523 = vmatpush.msrb.mxu1 %v1004_v8  ;;  %423 = vmatpush.msra.mxu0 %v394_v45 }
  0x37   : > { %545 = vmatpush.msrb.mxu2 %v404_v35  ;;  %488 = vmatpush.msra.mxu3 %v394_v45 }
  0x38   : > { %524 = vmatpush.msrb.mxu1 %v1010_v9  ;;  %424 = vmatpush.msra.mxu0 %v393_v46 }
  0x39   : > { %546 = vmatpush.msrb.mxu2 %v403_v36  ;;  %489 = vmatpush.msra.mxu3 %v393_v46 }
  0x3a   : > { %525 = vmatpush.msrb.mxu1 %v1022_v11  ;;  %425 = vmatpush.msra.mxu0 %v392_v47 }
  0x3b   : > { %547 = vmatpush.msrb.mxu2 %v402_v37  ;;  %490 = vmatpush.msra.mxu3 %v392_v47 }
  0x3c   : > { %526 = vmatpush.msrb.mxu1 %v1034_v13  ;;  %426 = vmatpush.msra.mxu0 %v391_v49 }
  0x3d   : > { %548 = vmatpush.msrb.mxu2 %v401_v38  ;;  %491 = vmatpush.msra.mxu3 %v391_v49 }
  0x3e   : > { %527 = vmatpush.msrb.mxu1 %v1046_v15  ;;  %427 = vmatpush.msra.mxu0 %v390_v52 }
  0x3f   : > { %549 = vmatpush.msrb.mxu2 %v400_v39  ;;  %492 = vmatpush.msra.mxu3 %v390_v52 }
  0x40   : > { %528 = vmatpush.msrb.mxu1 %v1058_v17  ;;  %501 = vmatpush.msrb.mxu0 %v966_v1 }
  0x41   : > { %550 = vmatpush.msrb.mxu2 %v399_v40  ;;  %428 = vmatmul.f32.vlgmr.msra.gmra.mxu0 %v986_v5 }
  0x42   : > { %529 = vmatpush.msrb.mxu1 %v1070_v19  ;;  %568 = vmatpush.msrb.mxu3 %v966_v1 }
  0x43   : > { %551 = vmatpush.msrb.mxu2 %v398_v41  ;;  %502 = vmatpush.msrb.mxu0 %v971_v2 }
  0x44   : > { %530 = vmatpush.msrb.mxu1 %v1082_v21  ;;  %569 = vmatpush.msrb.mxu3 %v971_v2 }
  0x45   : > { %552 = vmatpush.msrb.mxu2 %v397_v42  ;;  %503 = vmatpush.msrb.mxu0 %v977_v3 }
  0x46   : > { %531 = vmatpush.msrb.mxu1 %v1094_v23  ;;  %570 = vmatpush.msrb.mxu3 %v977_v3 }
  0x47   : > { %553 = vmatpush.msrb.mxu2 %v396_v43  ;;  %504 = vmatpush.msrb.mxu0 %v983_v4 }
  0x48   : > { %532 = vmatpush.msrb.mxu1 %v1106_v25  ;;  %571 = vmatpush.msrb.mxu3 %v983_v4 }
  0x49   : > { %554 = vmatpush.msrb.mxu2 %v395_v44  ;;  %505 = vmatpush.msrb.mxu0 %v996_v7 }
  0x4a   : > { %533 = vmatpush.msrb.mxu1 %v1118_v27  ;;  %572 = vmatpush.msrb.mxu3 %v996_v7 }
  0x4b   : > { %555 = vmatpush.msrb.mxu2 %v394_v45  ;;  %506 = vmatpush.msrb.mxu0 %v1015_v10 }
  0x4c   : > { %534 = vmatpush.msrb.mxu1 %v1130_v29  ;;  %573 = vmatpush.msrb.mxu3 %v1015_v10 }
  0x4d   : > { %556 = vmatpush.msrb.mxu2 %v393_v46  ;;  %507 = vmatpush.msrb.mxu0 %v1027_v12 }
  0x4e   : > { %535 = vmatpush.msrb.mxu1 %v1158_v31  ;;  %574 = vmatpush.msrb.mxu3 %v1027_v12 }
  0x4f   : > { %557 = vmatpush.msrb.mxu2 %v392_v47  ;;  %508 = vmatpush.msrb.mxu0 %v1039_v14 }
  0x50   : > { %536 = vmatpush.msrb.mxu1 %v1165_v32  ;;  %575 = vmatpush.msrb.mxu3 %v1039_v14 }
  0x51   : > { %558 = vmatpush.msrb.mxu2 %v391_v49  ;;  %509 = vmatpush.msrb.mxu0 %v1051_v16 }
  0x52   : > { %537 = vmatpush.msrb.mxu1 %v1172_v33  ;;  %576 = vmatpush.msrb.mxu3 %v1051_v16 }
  0x53   : > { %559 = vmatpush.msrb.mxu2 %v390_v52  ;;  %510 = vmatpush.msrb.mxu0 %v1063_v18 }
  0x54   : > { %611 = vmatpush.msra.mxu1 %v405_v34  ;;  %577 = vmatpush.msrb.mxu3 %v1063_v18 }
  0x55   : > { %511 = vmatpush.msrb.mxu0 %v1075_v20 }
  0x56   : > { %612 = vmatpush.msra.mxu1 %v404_v35  ;;  %578 = vmatpush.msrb.mxu3 %v1075_v20 }
  0x57   : > { %512 = vmatpush.msrb.mxu0 %v1087_v22 }
  0x58   : > { %613 = vmatpush.msra.mxu1 %v403_v36  ;;  %579 = vmatpush.msrb.mxu3 %v1087_v22 }
  0x59   : > { %513 = vmatpush.msrb.mxu0 %v1099_v24 }
  0x5a   : > { %614 = vmatpush.msra.mxu1 %v402_v37  ;;  %580 = vmatpush.msrb.mxu3 %v1099_v24 }
  0x5b   : > { %514 = vmatpush.msrb.mxu0 %v1111_v26 }
  0x5c   : > { %615 = vmatpush.msra.mxu1 %v401_v38  ;;  %581 = vmatpush.msrb.mxu3 %v1111_v26 }
  0x5d   : > { %515 = vmatpush.msrb.mxu0 %v1123_v28 }
  0x5e   : > { %616 = vmatpush.msra.mxu1 %v400_v39  ;;  %582 = vmatpush.msrb.mxu3 %v1123_v28 }
  0x5f   : > { %516 = vmatpush.msrb.mxu0 %v1135_v30 }
  0x60   : > { %617 = vmatpush.msra.mxu1 %v399_v40  ;;  %583 = vmatpush.msrb.mxu3 %v1135_v30 }
  0x61   : > { %589 = vmatpush.msra.mxu0 %v991_v6 }
  0x62   : > { %618 = vmatpush.msra.mxu1 %v398_v41 }
  0x63   : > { %590 = vmatpush.msra.mxu0 %v1004_v8 }
  0x64   : > { %619 = vmatpush.msra.mxu1 %v397_v42 }
  0x65   : > { %591 = vmatpush.msra.mxu0 %v1010_v9 }
  0x66   : > { %620 = vmatpush.msra.mxu1 %v396_v43 }
  0x67   : > { %592 = vmatpush.msra.mxu0 %v1022_v11 }
  0x68   : > { %621 = vmatpush.msra.mxu1 %v395_v44 }
  0x69   : > { %593 = vmatpush.msra.mxu0 %v1034_v13 }
  0x6a   : > { %622 = vmatpush.msra.mxu1 %v394_v45 }
  0x6b   : > { %594 = vmatpush.msra.mxu0 %v1046_v15 }
  0x6c   : > { %623 = vmatpush.msra.mxu1 %v393_v46 }
  0x6d   : > { %595 = vmatpush.msra.mxu0 %v1058_v17 }
  0x6e   : > { %624 = vmatpush.msra.mxu1 %v392_v47 }
  0x6f   : > { %596 = vmatpush.msra.mxu0 %v1070_v19 }
  0x70   : > { %625 = vmatpush.msra.mxu1 %v391_v49 }
  0x71   : > { %597 = vmatpush.msra.mxu0 %v1082_v21 }
  0x72   : > { %626 = vmatpush.msra.mxu1 %v390_v52 }
  0x73   : > { %598 = vmatpush.msra.mxu0 %v1094_v23 }
  0x75   : > { %599 = vmatpush.msra.mxu0 %v1106_v25 }
  0x77   : > { %600 = vmatpush.msra.mxu0 %v1118_v27 }
  0x79   : > { %601 = vmatpush.msra.mxu0 %v1130_v29 }
  0x7b   : > { %602 = vmatpush.msra.mxu0 %v1158_v31 }
  0x7d   : > { %603 = vmatpush.msra.mxu0 %v1165_v32 }
  0x7f   : > { %604 = vmatpush.msra.mxu0 %v1172_v33 }
  0xb0   : > { %v451_v50 = vpop.f32.mrf.mxu1 }
  0xb1   : > { %v452_v51 = vadd.f32 %v451_v50, %v433_v48 }
  0xb3   : > { %v454_v53 = vmax.f32 %v452_v51, 0.0 }
  0xb5   : > { %471 = vmatmul.f32.vlgmr.msra.gmra.mxu2 %v454_v53 }
  0xb6   : > { %635 = vmatpush.msra.mxu2 %v966_v1  ;;  %v832_v1 = vld [vmem:[%s948_s9 + $0x10] sm:$0xff] }
  0xb8   : > { %636 = vmatpush.msra.mxu2 %v971_v2 }
  0xba   : > { %637 = vmatpush.msra.mxu2 %v977_v3 }
  0xbc   : > { %638 = vmatpush.msra.mxu2 %v983_v4 }
  0xbe   : > { %639 = vmatpush.msra.mxu2 %v996_v7  ;;  %v429_v55 = vpop.f32.mrf.mxu0 }
  0xbf   : > { %v430_v56 = vadd.f32 %v862_v54, %v429_v55 }
  0xc0   : > { %640 = vmatpush.msra.mxu2 %v1015_v10  ;;  %v835_v10 = vld [vmem:[%s948_s9 + $0x18] sm:$0xff] }
  0xc1   : > { %432 = vst [vmem:[%s953_s12] sm:$0xff] %v430_v56 }
  0xc2   : > { %641 = vmatpush.msra.mxu2 %v1027_v12 }
  0xc4   : > { %642 = vmatpush.msra.mxu2 %v1039_v14 }
  0xc6   : > { %643 = vmatpush.msra.mxu2 %v1051_v16 }
  0xc8   : > { %644 = vmatpush.msra.mxu2 %v1063_v18 }
  0xca   : > { %645 = vmatpush.msra.mxu2 %v1075_v20 }
  0xcc   : > { %646 = vmatpush.msra.mxu2 %v1087_v22 }
  0xce   : > { %647 = vmatpush.msra.mxu2 %v1099_v24 }
  0xd0   : > { %648 = vmatpush.msra.mxu2 %v1111_v26 }
  0xd2   : > { %649 = vmatpush.msra.mxu2 %v1123_v28 }
  0xd4   : > { %650 = vmatpush.msra.mxu2 %v1135_v30 }
 0x138   : > { %v472_v57 = vpop.f32.mrf.mxu2 }
 0x139   : > { %827 = vst [vmem:[%s958_s15 + $0x8] sm:$0xff] %v472_v57  ;;  %493 = vmatmul.f32.vlgmr.msra.gmra.mxu3 %v472_v57  ;;  %517 = vmatmul.f32.vlgmr.msrb.gmra.mxu0 %v472_v57 }
 0x13a   : > { %656 = vmatpush.msra.mxu3 %v991_v6 }
 0x13c   : > { %657 = vmatpush.msra.mxu3 %v1004_v8 }
 0x13e   : > { %658 = vmatpush.msra.mxu3 %v1010_v9 }
 0x140   : > { %659 = vmatpush.msra.mxu3 %v1022_v11 }
 0x142   : > { %660 = vmatpush.msra.mxu3 %v1034_v13 }
 0x144   : > { %661 = vmatpush.msra.mxu3 %v1046_v15 }
 0x146   : > { %662 = vmatpush.msra.mxu3 %v1058_v17 }
 0x148   : > { %663 = vmatpush.msra.mxu3 %v1070_v19 }
 0x14a   : > { %664 = vmatpush.msra.mxu3 %v1082_v21 }
 0x14c   : > { %665 = vmatpush.msra.mxu3 %v1094_v23 }
 0x14e   : > { %666 = vmatpush.msra.mxu3 %v1106_v25 }
 0x150   : > { %667 = vmatpush.msra.mxu3 %v1118_v27 }
 0x152   : > { %668 = vmatpush.msra.mxu3 %v1130_v29 }
 0x154   : > { %669 = vmatpush.msra.mxu3 %v1158_v31 }
 0x156   : > { %670 = vmatpush.msra.mxu3 %v1165_v32 }
 0x158   : > { %671 = vmatpush.msra.mxu3 %v1172_v33 }
 0x1b6   : > { %v518_v59 = vpop.f32.mrf.mxu0 }
 0x1b7   : > { %v519_v60 = vadd.f32 %v829_v58, %v518_v59 }
 0x1b9   : > { %v521_v61 = vmax.f32 %v519_v60, 0.0 }
 0x1bb   : > { %538 = vmatmul.f32.vlgmr.msrb.gmra.mxu1 %v521_v61 }
 0x1bc   : > { %v494_v62 = vpop.f32.mrf.mxu3 }
 0x1bd   : > { %v495_v63 = vadd.f32 %v862_v54, %v494_v62 }
 0x1bf   : > { %828 = vst [vmem:[%s953_s12 + $0x8] sm:$0xff] %v495_v63 }
 0x238   : > { %v539_v0 = vpop.f32.mrf.mxu1 }
 0x239   : > { %830 = vst [vmem:[%s958_s15 + $0x10] sm:$0xff] %v539_v0  ;;  %560 = vmatmul.f32.vlgmr.msrb.gmra.mxu2 %v539_v0  ;;  %584 = vmatmul.f32.vlgmr.msrb.gmra.mxu3 %v539_v0 }
 0x2bc   : > { %v561_v2 = vpop.f32.mrf.mxu2  ;;  %v585_v3 = vpop.f32.mrf.mxu3 }
 0x2bd   : > { %v562_v4 = vadd.f32 %v862_v54, %v561_v2  ;;  %v586_v5 = vadd.f32 %v832_v1, %v585_v3 }
 0x2bf   : > { %831 = vst [vmem:[%s953_s12 + $0x10] sm:$0xff] %v562_v4  ;;  %v588_v6 = vmax.f32 %v586_v5, 0.0 }
 0x2c1   : > { %605 = vmatmul.f32.vlgmr.msra.gmra.mxu0 %v588_v6 }
 0x33e   : > { %v606_v7 = vpop.f32.mrf.mxu0 }
 0x33f   : > { %833 = vst [vmem:[%s958_s15 + $0x18] sm:$0xff] %v606_v7  ;;  %627 = vmatmul.f32.vlgmr.msra.gmra.mxu1 %v606_v7  ;;  %651 = vmatmul.f32.vlgmr.msra.gmra.mxu2 %v606_v7 }
 0x3bc   : > { %v628_v8 = vpop.f32.mrf.mxu1 }
 0x3bd   : > { %v629_v9 = vadd.f32 %v862_v54, %v628_v8 }
 0x3bf   : > { %834 = vst [vmem:[%s953_s12 + $0x18] sm:$0xff] %v629_v9 }
 0x3c2   : > { %v652_v11 = vpop.f32.mrf.mxu2 }
 0x3c3   : > { %v653_v12 = vadd.f32 %v835_v10, %v652_v11 }
 0x3c5   : > { %v655_v13 = vmax.f32 %v653_v12, 0.0 }
 0x3c7   : > { %672 = vmatmul.f32.vlgmr.msra.gmra.mxu3 %v655_v13 }
 0x44a   : > { %v673_v14 = vpop.f32.mrf.mxu3 }
 0x44b   : > { %676 = vst [vmem:[#allocation2] sm:$0xff] %v673_v14 }
 0x44c PF: > { %s18_s26 = sadd.s32 1, %s885_s26   ;;  %s1336_s24 = smov %s881_s25 }
 0x44d   : > { %p15_p6 = scmp.ge.s32.totalorder %s18_s26, 4   ;;  %s1337_s25 = smov %s1339_s27 }
 0x44f   :  { %17 = sbr.rel (!%p15_p6) target bundleno = 2 (0x2), region = 102 }

</bundles_post_ra>
